<compile_context>
chip_gen: v6e
topology: v6e:2x2x1
jax: 0.10.0
libtpu: 0.0.40
codegen_flags: <defaults>
</compile_context>

<pallas_src>
import functools

import jax
import jax.numpy as jnp
from jax import lax
from jax.experimental import pallas as pl
from jax.experimental.pallas import tpu as pltpu


def conv_attn_kernel(
    # per-batch-tile data refs
    src_ref, src_t_ref, seq_ref, seq_t_ref, seq_e_ref, mask_ref,
    # pre-split / pre-reshaped weights (full arrays, constant index_map)
    cw_seq_ref, cw_e_ref, conv_b_ref,
    wq_s_ref, wq_t_ref, wk_c_ref, wk_t_ref, wv_s_ref, wv_e_ref, wv_t_ref,
    fc_w_ref, fc_b_ref, ln_g_ref, ln_b_ref,
    w1_y_ref, w1_s_ref, b1_ref, w2_ref, b2_ref,
    # outputs
    out_ref, attn_ref,
    *, n_head, d_k, d_v, kernel_size, seq_len, tile_b):
  f32 = jnp.float32
  TB, N, ks, H = tile_b, seq_len, kernel_size, n_head

  src = src_ref[...]            # (TB, D)
  src_t = src_t_ref[...]        # (TB, Dt)
  seq = seq_ref[...]            # (TB*N, D)   flattened batch*sequence rows
  seq_t = seq_t_ref[...]        # (TB*N, Dt)
  seq_e = seq_e_ref[...]        # (TB*N, De)
  mask = mask_ref[...]          # (TB, N)  float: 1.0 -> null position

  D = src.shape[1]
  De = seq_e.shape[1]
  C = D + De
  M = C + src_t.shape[1]

  # ---- causal Conv1d over cat([seq, seq_e]) with split weights -----------------
  # conv[b, n] = conv_b + sum_t kx[b, n - (ks-1) + t] @ W[t]  (zero outside the seq)
  seq_pad = jnp.concatenate([jnp.zeros((ks - 1, D), f32), seq], axis=0)
  seqe_pad = jnp.concatenate([jnp.zeros((ks - 1, De), f32), seq_e], axis=0)
  pos = lax.broadcasted_iota(jnp.int32, (TB * N, 1), 0) % N   # position within each sequence
  conv = jnp.zeros((TB * N, C), f32)
  for t in range(ks):
    shift = ks - 1 - t
    tap = (jnp.dot(seq_pad[t:t + TB * N], cw_seq_ref[t], preferred_element_type=f32)
           + jnp.dot(seqe_pad[t:t + TB * N], cw_e_ref[t], preferred_element_type=f32))
    if shift > 0:
      # kill left-pad rows and cross-sequence bleed inside the flattened tile
      tap = jnp.where(pos >= shift, tap, 0.0)
    conv = conv + tap
  conv = conv + conv_b_ref[...]                               # (TB*N, C)

  # ---- q/k/v projections as batched 2D GEMMs (split weights, no concats) -------
  qh = (jnp.dot(src, wq_s_ref[...], preferred_element_type=f32)
        + jnp.dot(src_t, wq_t_ref[...], preferred_element_type=f32))        # (TB, H*dk)
  kh = (jnp.dot(conv, wk_c_ref[...], preferred_element_type=f32)
        + jnp.dot(seq_t, wk_t_ref[...], preferred_element_type=f32))        # (TB*N, H*dk)
  vh = (jnp.dot(seq, wv_s_ref[...], preferred_element_type=f32)
        + jnp.dot(seq_e, wv_e_ref[...], preferred_element_type=f32)
        + jnp.dot(seq_t, wv_t_ref[...], preferred_element_type=f32))        # (TB*N, H*dv)

  kh3 = kh.reshape(TB, N, H * d_k)                             # sublane-only reshape
  vh3 = vh.reshape(TB, N, H * d_v)

  inv_temp = 1.0 / (float(d_k) ** 0.5)
  mask3 = (mask > 0.5)[:, None, :]                             # (TB, 1, N)

  o_fc = jnp.zeros((TB, M), f32)                               # fc(attention out) accumulator
  for h in range(H):
    q_h = qh[:, None, h * d_k:(h + 1) * d_k]                   # (TB, 1, dk)
    k_h = kh3[:, :, h * d_k:(h + 1) * d_k]                     # (TB, N, dk)
    v_h = vh3[:, :, h * d_v:(h + 1) * d_v]                     # (TB, N, dv)
    s = jnp.einsum('bqk,bnk->bqn', q_h, k_h,
                   preferred_element_type=f32) * inv_temp      # (TB, 1, N)
    s = jnp.where(mask3, jnp.asarray(-1e10, f32), s)
    m = jnp.max(s, axis=-1, keepdims=True)
    e = jnp.exp(s - m)
    w = e * pl.reciprocal(jnp.sum(e, axis=-1, keepdims=True), approx=False)  # softmax
    attn_ref[h] = w[:, 0, :]                                   # head h rows -> (H, B, N) output
    o_h = jnp.einsum('bqn,bnd->bqd', w, v_h,
                     preferred_element_type=f32)               # (TB, 1, dv)
    o_fc = o_fc + jnp.dot(o_h[:, 0, :], fc_w_ref[h],
                          preferred_element_type=f32)          # accumulate fc per head
  o_fc = o_fc + fc_b_ref[...]                                  # (TB, M)

  # ---- residual + LayerNorm (residual is q = [src, 0, src_t]) -------------------
  q_res = jnp.concatenate([src, jnp.zeros((TB, De), f32), src_t], axis=-1)   # (TB, M)
  x = o_fc + q_res
  mu = jnp.mean(x, axis=-1, keepdims=True)
  var = jnp.mean((x - mu) ** 2, axis=-1, keepdims=True)
  y = (x - mu) * lax.rsqrt(var + 1e-5) * ln_g_ref[...] + ln_b_ref[...]       # (TB, M)

  # ---- MergeLayer: cat([y, src]) -> fc1 -> relu -> fc2 (split w1, no concat) ----
  h1 = jnp.maximum(
      jnp.dot(y, w1_y_ref[...], preferred_element_type=f32)
      + jnp.dot(src, w1_s_ref[...], preferred_element_type=f32)
      + b1_ref[...], 0.0)
  out_ref[...] = jnp.dot(h1, w2_ref[...], preferred_element_type=f32) + b2_ref[...]


def conv_attn_forward(src, src_t, seq, seq_t, seq_e, mask, params,
                      *, n_head=2, kernel_size=3, batch_tile=256):
  B, D = src.shape
  _, N, _ = seq.shape
  Dt = src_t.shape[-1]
  De = seq_e.shape[-1]
  C = D + De
  M = C + Dt                     # model_dim
  d_k = d_v = M // n_head
  f32 = jnp.float32

  # Batch tile: whole batch when small, otherwise a sublane-aligned tile + padding.
  batch_tile = max(8, (batch_tile // 8) * 8)
  TB = B if B <= batch_tile else batch_tile
  Bp = ((B + TB - 1) // TB) * TB
  if Bp != B:
    pad = Bp - B
    pad_b = lambda a: jnp.pad(a, ((0, pad),) + ((0, 0),) * (a.ndim - 1))
    src, src_t, seq, seq_t, seq_e, mask = map(
        pad_b, (src, src_t, seq, seq_t, seq_e, mask))

  # Flatten sequences so every projection is one GEMM over TB*N rows.
  src_f = src.astype(f32)                          # (Bp, D)
  src_t_f = src_t.reshape(Bp, Dt).astype(f32)      # (Bp, Dt)
  seq_f = seq.reshape(Bp * N, D).astype(f32)       # (Bp*N, D)
  seq_t_f = seq_t.reshape(Bp * N, Dt).astype(f32)  # (Bp*N, Dt)
  seq_e_f = seq_e.reshape(Bp * N, De).astype(f32)  # (Bp*N, De)
  mask_f = mask.astype(f32)                        # (Bp, N)

  # ---- host-side weight prep: split / reshape so the kernel never concats ------
  conv_w = params["conv_w"].astype(f32)            # (ks, C, C)
  weights = [
      conv_w[:, :D, :],                            # cw_seq  (ks, D, C)
      conv_w[:, D:, :],                            # cw_e    (ks, De, C)
      params["conv_b"].astype(f32),                # (1, C)
      params["wq"][:D].astype(f32),                # wq_src  (D, H*dk)
      params["wq"][D + De:].astype(f32),           # wq_time (Dt, H*dk)
      params["wk"][:C].astype(f32),                # wk_conv (C, H*dk)
      params["wk"][C:].astype(f32),                # wk_time (Dt, H*dk)
      params["wv"][:D].astype(f32),                # wv_seq  (D, H*dv)
      params["wv"][D:C].astype(f32),               # wv_edge (De, H*dv)
      params["wv"][C:].astype(f32),                # wv_time (Dt, H*dv)
      params["fc_w"].astype(f32).reshape(n_head, d_v, M),  # (H, dv, M)
      params["fc_b"].astype(f32),                  # (1, M)
      params["ln_g"].astype(f32),                  # (1, M)
      params["ln_b"].astype(f32),                  # (1, M)
      params["w1"][:M].astype(f32),                # w1_y   (M, D)
      params["w1"][M:].astype(f32),                # w1_src (D, D)
      params["b1"].astype(f32),                    # (1, D)
      params["w2"].astype(f32),                    # (D, D)
      params["b2"].astype(f32),                    # (1, D)
  ]

  def full_spec(a):
    return pl.BlockSpec(a.shape, lambda b, nd=a.ndim: (0,) * nd)

  data_specs = [
      pl.BlockSpec((TB, D), lambda b: (b, 0)),         # src
      pl.BlockSpec((TB, Dt), lambda b: (b, 0)),        # src_t
      pl.BlockSpec((TB * N, D), lambda b: (b, 0)),     # seq   (flattened)
      pl.BlockSpec((TB * N, Dt), lambda b: (b, 0)),    # seq_t (flattened)
      pl.BlockSpec((TB * N, De), lambda b: (b, 0)),    # seq_e (flattened)
      pl.BlockSpec((TB, N), lambda b: (b, 0)),         # mask
  ]
  weight_specs = [full_spec(w) for w in weights]

  kernel = functools.partial(
      conv_attn_kernel, n_head=n_head, d_k=d_k, d_v=d_v,
      kernel_size=kernel_size, seq_len=N, tile_b=TB)

  out, attn = pl.pallas_call(
      kernel,
      out_shape=(
          jax.ShapeDtypeStruct((Bp, D), f32),
          jax.ShapeDtypeStruct((n_head, Bp, N), f32),
      ),
      grid_spec=pltpu.PrefetchScalarGridSpec(
          num_scalar_prefetch=0,
          grid=(Bp // TB,),
          in_specs=data_specs + weight_specs,
          out_specs=[
              pl.BlockSpec((TB, D), lambda b: (b, 0)),
              pl.BlockSpec((n_head, TB, N), lambda b: (0, b, 0)),
          ]),
      compiler_params=pltpu.CompilerParams(
          dimension_semantics=("parallel",),          # independent batch tiles (v7x 2 TCs)
          vmem_limit_bytes=32 * 1024 * 1024),
  )(src_f, src_t_f, seq_f, seq_t_f, seq_e_f, mask_f, *weights)

  # PyTorch attn is [n_head * B, N] with head-major index h*B + b; the kernel
  # already emits (n_head, B, N), so this is just a (free) reshape.
  if Bp != B:
    out = out[:B]
    attn = attn[:, :B, :]
  return out, attn.reshape(n_head * B, N)


def init_params(key, *, feat_dim, edge_dim, time_dim, n_head, kernel_size):
  # Deterministic synthetic parameters with the shapes implied by __init__.
  # nn.Linear weights [out, in] are stored pre-transposed as [in, out];
  # Conv1d weight [C_out, C_in, ks] is stored as [ks, C_in, C_out].
  D, De, Dt = feat_dim, edge_dim, time_dim
  M = D + De + Dt
  C = D + De
  d_k = d_v = M // n_head
  ks = jax.random.split(key, 12)
  s = 0.1
  params = {
      "conv_w": s * jax.random.normal(ks[0], (kernel_size, C, C), jnp.float32),
      "conv_b": s * jax.random.normal(ks[1], (1, C), jnp.float32),
      "wq": s * jax.random.normal(ks[2], (M, n_head * d_k), jnp.float32),
      "wk": s * jax.random.normal(ks[3], (M, n_head * d_k), jnp.float32),
      "wv": s * jax.random.normal(ks[4], (M, n_head * d_v), jnp.float32),
      "fc_w": s * jax.random.normal(ks[5], (n_head * d_v, M), jnp.float32),
      "fc_b": s * jax.random.normal(ks[6], (1, M), jnp.float32),
      "ln_g": jnp.ones((1, M), jnp.float32),
      "ln_b": jnp.zeros((1, M), jnp.float32),
      "w1": s * jax.random.normal(ks[7], (M + D, D), jnp.float32),
      "b1": s * jax.random.normal(ks[8], (1, D), jnp.float32),
      "w2": s * jax.random.normal(ks[9], (D, D), jnp.float32),
      "b2": s * jax.random.normal(ks[10], (1, D), jnp.float32),
  }
  return params


if __name__ == "__main__":
  B, N = 2, 8
  D = De = Dt = 16          # PyTorch forward semantics imply edge_dim == feat_dim
  n_head, kernel_size = 2, 3

  key = jax.random.PRNGKey(0)
  k_in, k_par = jax.random.split(key)
  kd = jax.random.split(k_in, 6)

  src = jax.random.normal(kd[0], (B, D), jnp.float32)
  src_t = jax.random.normal(kd[1], (B, 1, Dt), jnp.float32)
  seq = jax.random.normal(kd[2], (B, N, D), jnp.float32)
  seq_t = jax.random.normal(kd[3], (B, N, Dt), jnp.float32)
  seq_e = jax.random.normal(kd[4], (B, N, De), jnp.float32)
  mask = jax.random.bernoulli(kd[5], 0.3, (B, N))
  mask = mask.at[:, 0].set(False)   # keep at least one valid position per row

  params = init_params(k_par, feat_dim=D, edge_dim=De, time_dim=Dt,
                       n_head=n_head, kernel_size=kernel_size)

  out, attn = conv_attn_forward(src, src_t, seq, seq_t, seq_e, mask, params,
                                n_head=n_head, kernel_size=kernel_size)
  jax.block_until_ready((out, attn))
  assert out.shape == (B, D) and attn.shape == (n_head * B, N)
  print("KERNEL_OK")
</pallas_src>

<mosaic_0001>
module attributes {stable_mosaic.version = 11 : i64} {
  func.func @conv_attn_kernel(%arg0: i32, %arg1: memref<2x16xf32, #tpu.memory_space<vmem>>, %arg2: memref<2x16xf32, #tpu.memory_space<vmem>>, %arg3: memref<16x16xf32, #tpu.memory_space<vmem>>, %arg4: memref<16x16xf32, #tpu.memory_space<vmem>>, %arg5: memref<16x16xf32, #tpu.memory_space<vmem>>, %arg6: memref<2x8xf32, #tpu.memory_space<vmem>>, %arg7: memref<3x16x32xf32, #tpu.memory_space<vmem>>, %arg8: memref<3x16x32xf32, #tpu.memory_space<vmem>>, %arg9: memref<1x32xf32, #tpu.memory_space<vmem>>, %arg10: memref<16x48xf32, #tpu.memory_space<vmem>>, %arg11: memref<16x48xf32, #tpu.memory_space<vmem>>, %arg12: memref<32x48xf32, #tpu.memory_space<vmem>>, %arg13: memref<16x48xf32, #tpu.memory_space<vmem>>, %arg14: memref<16x48xf32, #tpu.memory_space<vmem>>, %arg15: memref<16x48xf32, #tpu.memory_space<vmem>>, %arg16: memref<16x48xf32, #tpu.memory_space<vmem>>, %arg17: memref<2x24x48xf32, #tpu.memory_space<vmem>>, %arg18: memref<1x48xf32, #tpu.memory_space<vmem>>, %arg19: memref<1x48xf32, #tpu.memory_space<vmem>>, %arg20: memref<1x48xf32, #tpu.memory_space<vmem>>, %arg21: memref<48x16xf32, #tpu.memory_space<vmem>>, %arg22: memref<16x16xf32, #tpu.memory_space<vmem>>, %arg23: memref<1x16xf32, #tpu.memory_space<vmem>>, %arg24: memref<16x16xf32, #tpu.memory_space<vmem>>, %arg25: memref<1x16xf32, #tpu.memory_space<vmem>>, %arg26: memref<2x16xf32, #tpu.memory_space<vmem>>, %arg27: memref<2x2x8xf32, #tpu.memory_space<vmem>>) attributes {dimension_semantics = [#tpu.dimension_semantics<parallel>], iteration_bounds = array<i64: 1>, scalar_prefetch = 0 : i64, scratch_operands = 0 : i64, tpu.core_type = #tpu.core_type<tc>, window_params = [{transform_indices = @transform_0, window_bounds = array<i64: 2, 16>}, {transform_indices = @transform_1, window_bounds = array<i64: 2, 16>}, {transform_indices = @transform_2, window_bounds = array<i64: 16, 16>}, {transform_indices = @transform_3, window_bounds = array<i64: 16, 16>}, {transform_indices = @transform_4, window_bounds = array<i64: 16, 16>}, {transform_indices = @transform_5, window_bounds = array<i64: 2, 8>}, {pipeline_mode = #tpu.pipeline_mode<synchronous>, transform_indices = @transform_6, window_bounds = array<i64: 3, 16, 32>}, {pipeline_mode = #tpu.pipeline_mode<synchronous>, transform_indices = @transform_7, window_bounds = array<i64: 3, 16, 32>}, {pipeline_mode = #tpu.pipeline_mode<synchronous>, transform_indices = @transform_8, window_bounds = array<i64: 1, 32>}, {pipeline_mode = #tpu.pipeline_mode<synchronous>, transform_indices = @transform_9, window_bounds = array<i64: 16, 48>}, {pipeline_mode = #tpu.pipeline_mode<synchronous>, transform_indices = @transform_10, window_bounds = array<i64: 16, 48>}, {pipeline_mode = #tpu.pipeline_mode<synchronous>, transform_indices = @transform_11, window_bounds = array<i64: 32, 48>}, {pipeline_mode = #tpu.pipeline_mode<synchronous>, transform_indices = @transform_12, window_bounds = array<i64: 16, 48>}, {pipeline_mode = #tpu.pipeline_mode<synchronous>, transform_indices = @transform_13, window_bounds = array<i64: 16, 48>}, {pipeline_mode = #tpu.pipeline_mode<synchronous>, transform_indices = @transform_14, window_bounds = array<i64: 16, 48>}, {pipeline_mode = #tpu.pipeline_mode<synchronous>, transform_indices = @transform_15, window_bounds = array<i64: 16, 48>}, {pipeline_mode = #tpu.pipeline_mode<synchronous>, transform_indices = @transform_16, window_bounds = array<i64: 2, 24, 48>}, {pipeline_mode = #tpu.pipeline_mode<synchronous>, transform_indices = @transform_17, window_bounds = array<i64: 1, 48>}, {pipeline_mode = #tpu.pipeline_mode<synchronous>, transform_indices = @transform_18, window_bounds = array<i64: 1, 48>}, {pipeline_mode = #tpu.pipeline_mode<synchronous>, transform_indices = @transform_19, window_bounds = array<i64: 1, 48>}, {pipeline_mode = #tpu.pipeline_mode<synchronous>, transform_indices = @transform_20, window_bounds = array<i64: 48, 16>}, {pipeline_mode = #tpu.pipeline_mode<synchronous>, transform_indices = @transform_21, window_bounds = array<i64: 16, 16>}, {pipeline_mode = #tpu.pipeline_mode<synchronous>, transform_indices = @transform_22, window_bounds = array<i64: 1, 16>}, {pipeline_mode = #tpu.pipeline_mode<synchronous>, transform_indices = @transform_23, window_bounds = array<i64: 16, 16>}, {pipeline_mode = #tpu.pipeline_mode<synchronous>, transform_indices = @transform_24, window_bounds = array<i64: 1, 16>}, {transform_indices = @transform_25, window_bounds = array<i64: 2, 16>}, {transform_indices = @transform_26, window_bounds = array<i64: 2, 2, 8>}]} {
    %c0 = arith.constant 0 : index
    %c0_0 = arith.constant 0 : index
    %0 = vector.load %arg1[%c0, %c0_0] : memref<2x16xf32, #tpu.memory_space<vmem>>, vector<2x16xf32>
    %c0_1 = arith.constant 0 : index
    %c0_2 = arith.constant 0 : index
    %1 = vector.load %arg2[%c0_1, %c0_2] : memref<2x16xf32, #tpu.memory_space<vmem>>, vector<2x16xf32>
    %c0_3 = arith.constant 0 : index
    %c0_4 = arith.constant 0 : index
    %2 = vector.load %arg3[%c0_3, %c0_4] : memref<16x16xf32, #tpu.memory_space<vmem>>, vector<16x16xf32>
    %c0_5 = arith.constant 0 : index
    %c0_6 = arith.constant 0 : index
    %3 = vector.load %arg4[%c0_5, %c0_6] : memref<16x16xf32, #tpu.memory_space<vmem>>, vector<16x16xf32>
    %c0_7 = arith.constant 0 : index
    %c0_8 = arith.constant 0 : index
    %4 = vector.load %arg5[%c0_7, %c0_8] : memref<16x16xf32, #tpu.memory_space<vmem>>, vector<16x16xf32>
    %c0_9 = arith.constant 0 : index
    %c0_10 = arith.constant 0 : index
    %5 = vector.load %arg6[%c0_9, %c0_10] : memref<2x8xf32, #tpu.memory_space<vmem>>, vector<2x8xf32>
    %cst = arith.constant 0.000000e+00 : f32
    %6 = vector.broadcast %cst : f32 to vector<2x16xf32>
    %7 = tpu.concatenate %6, %2 in 0 : vector<2x16xf32>, vector<16x16xf32> -> vector<18x16xf32>
    %cst_11 = arith.constant 0.000000e+00 : f32
    %8 = vector.broadcast %cst_11 : f32 to vector<2x16xf32>
    %9 = tpu.concatenate %8, %4 in 0 : vector<2x16xf32>, vector<16x16xf32> -> vector<18x16xf32>
    %10 = tpu.iota {dimensions = array<i32: 0>} : vector<16x1xi32>
    %c8_i32 = arith.constant 8 : i32
    %c0_i32 = arith.constant 0 : i32
    %11 = arith.cmpi eq, %c8_i32, %c0_i32 : i32
    %c1_i32 = arith.constant 1 : i32
    %12 = arith.select %11, %c1_i32, %c8_i32 : i32
    %13 = vector.broadcast %12 : i32 to vector<16x1xi32>
    %14 = arith.remsi %10, %13 : vector<16x1xi32>
    %c0_i32_12 = arith.constant 0 : i32
    %15 = vector.broadcast %c0_i32_12 : i32 to vector<16x1xi32>
    %16 = arith.cmpi ne, %14, %15 : vector<16x1xi32>
    %c0_i32_13 = arith.constant 0 : i32
    %17 = vector.broadcast %c0_i32_13 : i32 to vector<16x1xi32>
    %18 = arith.cmpi slt, %14, %17 : vector<16x1xi32>
    %c0_i32_14 = arith.constant 0 : i32
    %19 = arith.cmpi slt, %12, %c0_i32_14 : i32
    %20 = vector.broadcast %19 : i1 to vector<16x1xi1>
    %21 = vector.broadcast %20 : vector<16x1xi1> to vector<16x1xi1>
    %22 = arith.xori %18, %21 : vector<16x1xi1>
    %23 = arith.andi %22, %16 : vector<16x1xi1>
    %24 = vector.broadcast %12 : i32 to vector<16x1xi32>
    %25 = arith.addi %14, %24 : vector<16x1xi32>
    %26 = arith.select %23, %25, %14 : vector<16x1xi1>, vector<16x1xi32>
    %cst_15 = arith.constant 0.000000e+00 : f32
    %27 = vector.broadcast %cst_15 : f32 to vector<16x32xf32>
    %28 = vector.extract_strided_slice %7 {offsets = [0, 0], sizes = [16, 16], strides = [1, 1]} : vector<18x16xf32> to vector<16x16xf32>
    %c0_16 = arith.constant 0 : index
    %c0_17 = arith.constant 0 : index
    %c0_18 = arith.constant 0 : index
    %29 = vector.load %arg7[%c0_16, %c0_17, %c0_18] : memref<3x16x32xf32, #tpu.memory_space<vmem>>, vector<1x16x32xf32>
    %30 = vector.shape_cast %29 : vector<1x16x32xf32> to vector<16x32xf32>
    %cst_19 = arith.constant dense<0.000000e+00> : vector<16x32xf32>
    %31 = tpu.matmul %28, %30, %cst_19 {dimension_numbers = #tpu.dot_dimension_numbers<[1], [0], [0], [1], [0, 0, 1, 1], [], []>} : vector<16x16xf32>, vector<16x32xf32>, vector<16x32xf32> -> vector<16x32xf32>
    %32 = vector.extract_strided_slice %9 {offsets = [0, 0], sizes = [16, 16], strides = [1, 1]} : vector<18x16xf32> to vector<16x16xf32>
    %c0_20 = arith.constant 0 : index
    %c0_21 = arith.constant 0 : index
    %c0_22 = arith.constant 0 : index
    %33 = vector.load %arg8[%c0_20, %c0_21, %c0_22] : memref<3x16x32xf32, #tpu.memory_space<vmem>>, vector<1x16x32xf32>
    %34 = vector.shape_cast %33 : vector<1x16x32xf32> to vector<16x32xf32>
    %cst_23 = arith.constant dense<0.000000e+00> : vector<16x32xf32>
    %35 = tpu.matmul %32, %34, %cst_23 {dimension_numbers = #tpu.dot_dimension_numbers<[1], [0], [0], [1], [0, 0, 1, 1], [], []>} : vector<16x16xf32>, vector<16x32xf32>, vector<16x32xf32> -> vector<16x32xf32>
    %36 = arith.addf %31, %35 : vector<16x32xf32>
    %c2_i32 = arith.constant 2 : i32
    %37 = vector.broadcast %c2_i32 : i32 to vector<16x1xi32>
    %38 = arith.cmpi sge, %26, %37 : vector<16x1xi32>
    %cst_24 = arith.constant 0.000000e+00 : f32
    %39 = vector.shape_cast %38 : vector<16x1xi1> to vector<16x1xi1>
    %40 = vector.broadcast %39 : vector<16x1xi1> to vector<16x32xi1>
    %41 = vector.broadcast %cst_24 : f32 to vector<16x32xf32>
    %42 = arith.select %40, %36, %41 : vector<16x32xi1>, vector<16x32xf32>
    %43 = arith.addf %27, %42 : vector<16x32xf32>
    %44 = vector.extract_strided_slice %7 {offsets = [1, 0], sizes = [16, 16], strides = [1, 1]} : vector<18x16xf32> to vector<16x16xf32>
    %c1 = arith.constant 1 : index
    %c0_25 = arith.constant 0 : index
    %c0_26 = arith.constant 0 : index
    %45 = vector.load %arg7[%c1, %c0_25, %c0_26] : memref<3x16x32xf32, #tpu.memory_space<vmem>>, vector<1x16x32xf32>
    %46 = vector.shape_cast %45 : vector<1x16x32xf32> to vector<16x32xf32>
    %cst_27 = arith.constant dense<0.000000e+00> : vector<16x32xf32>
    %47 = tpu.matmul %44, %46, %cst_27 {dimension_numbers = #tpu.dot_dimension_numbers<[1], [0], [0], [1], [0, 0, 1, 1], [], []>} : vector<16x16xf32>, vector<16x32xf32>, vector<16x32xf32> -> vector<16x32xf32>
    %48 = vector.extract_strided_slice %9 {offsets = [1, 0], sizes = [16, 16], strides = [1, 1]} : vector<18x16xf32> to vector<16x16xf32>
    %c1_28 = arith.constant 1 : index
    %c0_29 = arith.constant 0 : index
    %c0_30 = arith.constant 0 : index
    %49 = vector.load %arg8[%c1_28, %c0_29, %c0_30] : memref<3x16x32xf32, #tpu.memory_space<vmem>>, vector<1x16x32xf32>
    %50 = vector.shape_cast %49 : vector<1x16x32xf32> to vector<16x32xf32>
    %cst_31 = arith.constant dense<0.000000e+00> : vector<16x32xf32>
    %51 = tpu.matmul %48, %50, %cst_31 {dimension_numbers = #tpu.dot_dimension_numbers<[1], [0], [0], [1], [0, 0, 1, 1], [], []>} : vector<16x16xf32>, vector<16x32xf32>, vector<16x32xf32> -> vector<16x32xf32>
    %52 = arith.addf %47, %51 : vector<16x32xf32>
    %c1_i32_32 = arith.constant 1 : i32
    %53 = vector.broadcast %c1_i32_32 : i32 to vector<16x1xi32>
    %54 = arith.cmpi sge, %26, %53 : vector<16x1xi32>
    %cst_33 = arith.constant 0.000000e+00 : f32
    %55 = vector.shape_cast %54 : vector<16x1xi1> to vector<16x1xi1>
    %56 = vector.broadcast %55 : vector<16x1xi1> to vector<16x32xi1>
    %57 = vector.broadcast %cst_33 : f32 to vector<16x32xf32>
    %58 = arith.select %56, %52, %57 : vector<16x32xi1>, vector<16x32xf32>
    %59 = arith.addf %43, %58 : vector<16x32xf32>
    %60 = vector.extract_strided_slice %7 {offsets = [2, 0], sizes = [16, 16], strides = [1, 1]} : vector<18x16xf32> to vector<16x16xf32>
    %c2 = arith.constant 2 : index
    %c0_34 = arith.constant 0 : index
    %c0_35 = arith.constant 0 : index
    %61 = vector.load %arg7[%c2, %c0_34, %c0_35] : memref<3x16x32xf32, #tpu.memory_space<vmem>>, vector<1x16x32xf32>
    %62 = vector.shape_cast %61 : vector<1x16x32xf32> to vector<16x32xf32>
    %cst_36 = arith.constant dense<0.000000e+00> : vector<16x32xf32>
    %63 = tpu.matmul %60, %62, %cst_36 {dimension_numbers = #tpu.dot_dimension_numbers<[1], [0], [0], [1], [0, 0, 1, 1], [], []>} : vector<16x16xf32>, vector<16x32xf32>, vector<16x32xf32> -> vector<16x32xf32>
    %64 = vector.extract_strided_slice %9 {offsets = [2, 0], sizes = [16, 16], strides = [1, 1]} : vector<18x16xf32> to vector<16x16xf32>
    %c2_37 = arith.constant 2 : index
    %c0_38 = arith.constant 0 : index
    %c0_39 = arith.constant 0 : index
    %65 = vector.load %arg8[%c2_37, %c0_38, %c0_39] : memref<3x16x32xf32, #tpu.memory_space<vmem>>, vector<1x16x32xf32>
    %66 = vector.shape_cast %65 : vector<1x16x32xf32> to vector<16x32xf32>
    %cst_40 = arith.constant dense<0.000000e+00> : vector<16x32xf32>
    %67 = tpu.matmul %64, %66, %cst_40 {dimension_numbers = #tpu.dot_dimension_numbers<[1], [0], [0], [1], [0, 0, 1, 1], [], []>} : vector<16x16xf32>, vector<16x32xf32>, vector<16x32xf32> -> vector<16x32xf32>
    %68 = arith.addf %63, %67 : vector<16x32xf32>
    %69 = arith.addf %59, %68 : vector<16x32xf32>
    %c0_41 = arith.constant 0 : index
    %c0_42 = arith.constant 0 : index
    %70 = vector.load %arg9[%c0_41, %c0_42] : memref<1x32xf32, #tpu.memory_space<vmem>>, vector<1x32xf32>
    %71 = vector.broadcast %70 : vector<1x32xf32> to vector<16x32xf32>
    %72 = arith.addf %69, %71 : vector<16x32xf32>
    %c0_43 = arith.constant 0 : index
    %c0_44 = arith.constant 0 : index
    %73 = vector.load %arg10[%c0_43, %c0_44] : memref<16x48xf32, #tpu.memory_space<vmem>>, vector<16x48xf32>
    %cst_45 = arith.constant dense<0.000000e+00> : vector<2x48xf32>
    %74 = tpu.matmul %0, %73, %cst_45 {dimension_numbers = #tpu.dot_dimension_numbers<[1], [0], [0], [1], [0, 0, 1, 1], [], []>} : vector<2x16xf32>, vector<16x48xf32>, vector<2x48xf32> -> vector<2x48xf32>
    %c0_46 = arith.constant 0 : index
    %c0_47 = arith.constant 0 : index
    %75 = vector.load %arg11[%c0_46, %c0_47] : memref<16x48xf32, #tpu.memory_space<vmem>>, vector<16x48xf32>
    %cst_48 = arith.constant dense<0.000000e+00> : vector<2x48xf32>
    %76 = tpu.matmul %1, %75, %cst_48 {dimension_numbers = #tpu.dot_dimension_numbers<[1], [0], [0], [1], [0, 0, 1, 1], [], []>} : vector<2x16xf32>, vector<16x48xf32>, vector<2x48xf32> -> vector<2x48xf32>
    %77 = arith.addf %74, %76 : vector<2x48xf32>
    %c0_49 = arith.constant 0 : index
    %c0_50 = arith.constant 0 : index
    %78 = vector.load %arg12[%c0_49, %c0_50] : memref<32x48xf32, #tpu.memory_space<vmem>>, vector<32x48xf32>
    %cst_51 = arith.constant dense<0.000000e+00> : vector<16x48xf32>
    %79 = tpu.matmul %72, %78, %cst_51 {dimension_numbers = #tpu.dot_dimension_numbers<[1], [0], [0], [1], [0, 0, 1, 1], [], []>} : vector<16x32xf32>, vector<32x48xf32>, vector<16x48xf32> -> vector<16x48xf32>
    %c0_52 = arith.constant 0 : index
    %c0_53 = arith.constant 0 : index
    %80 = vector.load %arg13[%c0_52, %c0_53] : memref<16x48xf32, #tpu.memory_space<vmem>>, vector<16x48xf32>
    %cst_54 = arith.constant dense<0.000000e+00> : vector<16x48xf32>
    %81 = tpu.matmul %3, %80, %cst_54 {dimension_numbers = #tpu.dot_dimension_numbers<[1], [0], [0], [1], [0, 0, 1, 1], [], []>} : vector<16x16xf32>, vector<16x48xf32>, vector<16x48xf32> -> vector<16x48xf32>
    %82 = arith.addf %79, %81 : vector<16x48xf32>
    %c0_55 = arith.constant 0 : index
    %c0_56 = arith.constant 0 : index
    %83 = vector.load %arg14[%c0_55, %c0_56] : memref<16x48xf32, #tpu.memory_space<vmem>>, vector<16x48xf32>
    %cst_57 = arith.constant dense<0.000000e+00> : vector<16x48xf32>
    %84 = tpu.matmul %2, %83, %cst_57 {dimension_numbers = #tpu.dot_dimension_numbers<[1], [0], [0], [1], [0, 0, 1, 1], [], []>} : vector<16x16xf32>, vector<16x48xf32>, vector<16x48xf32> -> vector<16x48xf32>
    %c0_58 = arith.constant 0 : index
    %c0_59 = arith.constant 0 : index
    %85 = vector.load %arg15[%c0_58, %c0_59] : memref<16x48xf32, #tpu.memory_space<vmem>>, vector<16x48xf32>
    %cst_60 = arith.constant dense<0.000000e+00> : vector<16x48xf32>
    %86 = tpu.matmul %4, %85, %cst_60 {dimension_numbers = #tpu.dot_dimension_numbers<[1], [0], [0], [1], [0, 0, 1, 1], [], []>} : vector<16x16xf32>, vector<16x48xf32>, vector<16x48xf32> -> vector<16x48xf32>
    %87 = arith.addf %84, %86 : vector<16x48xf32>
    %c0_61 = arith.constant 0 : index
    %c0_62 = arith.constant 0 : index
    %88 = vector.load %arg16[%c0_61, %c0_62] : memref<16x48xf32, #tpu.memory_space<vmem>>, vector<16x48xf32>
    %cst_63 = arith.constant dense<0.000000e+00> : vector<16x48xf32>
    %89 = tpu.matmul %3, %88, %cst_63 {dimension_numbers = #tpu.dot_dimension_numbers<[1], [0], [0], [1], [0, 0, 1, 1], [], []>} : vector<16x16xf32>, vector<16x48xf32>, vector<16x48xf32> -> vector<16x48xf32>
    %90 = arith.addf %87, %89 : vector<16x48xf32>
    %91 = vector.shape_cast %82 : vector<16x48xf32> to vector<2x8x48xf32>
    %92 = vector.shape_cast %90 : vector<16x48xf32> to vector<2x8x48xf32>
    %cst_64 = arith.constant 5.000000e-01 : f32
    %93 = vector.broadcast %cst_64 : f32 to vector<2x8xf32>
    %94 = arith.cmpf ogt, %5, %93 : vector<2x8xf32>
    %95 = vector.shape_cast %94 : vector<2x8xi1> to vector<2x1x8xi1>
    %cst_65 = arith.constant 0.000000e+00 : f32
    %96 = vector.broadcast %cst_65 : f32 to vector<2x48xf32>
    %97 = vector.extract_strided_slice %77 {offsets = [0, 0], sizes = [2, 24], strides = [1, 1]} : vector<2x48xf32> to vector<2x24xf32>
    %98 = vector.shape_cast %97 : vector<2x24xf32> to vector<2x1x24xf32>
    %99 = vector.extract_strided_slice %91 {offsets = [0, 0, 0], sizes = [2, 8, 24], strides = [1, 1, 1]} : vector<2x8x48xf32> to vector<2x8x24xf32>
    %100 = vector.extract_strided_slice %92 {offsets = [0, 0, 0], sizes = [2, 8, 24], strides = [1, 1, 1]} : vector<2x8x48xf32> to vector<2x8x24xf32>
    "tpu.trace_start"() <{level = 10 : i32, message = "bqk,bnk->bqn"}> : () -> ()
    %cst_66 = arith.constant dense<0.000000e+00> : vector<2x1x8xf32>
    %101 = tpu.matmul %98, %99, %cst_66 {dimension_numbers = #tpu.dot_dimension_numbers<[2], [2], [1], [1], [0, 0, 0, 1, 1, 1], [0], [0]>} : vector<2x1x24xf32>, vector<2x8x24xf32>, vector<2x1x8xf32> -> vector<2x1x8xf32>
    "tpu.trace_stop"() : () -> ()
    %cst_67 = arith.constant 0.204124153 : f32
    %102 = vector.broadcast %cst_67 : f32 to vector<2x1x8xf32>
    %103 = arith.mulf %101, %102 : vector<2x1x8xf32>
    %cst_68 = arith.constant -1.000000e+10 : f32
    %104 = vector.broadcast %cst_68 : f32 to vector<2x1x8xf32>
    %105 = arith.select %95, %104, %103 : vector<2x1x8xi1>, vector<2x1x8xf32>
    %cst_69 = arith.constant dense<0xFF800000> : vector<2x1xf32>
    %106 = vector.multi_reduction <maximumf>, %105, %cst_69 [2] : vector<2x1x8xf32> to vector<2x1xf32>
    %107 = vector.shape_cast %106 : vector<2x1xf32> to vector<2x1x1xf32>
    %108 = vector.broadcast %107 : vector<2x1x1xf32> to vector<2x1x8xf32>
    %109 = arith.subf %105, %108 : vector<2x1x8xf32>
    %110 = math.exp %109 : vector<2x1x8xf32>
    %cst_70 = arith.constant dense<0.000000e+00> : vector<2x1xf32>
    %111 = vector.multi_reduction <add>, %110, %cst_70 [2] : vector<2x1x8xf32> to vector<2x1xf32>
    %112 = vector.shape_cast %111 : vector<2x1xf32> to vector<2x1x1xf32>
    %113 = tpu.reciprocal %112 : vector<2x1x1xf32> -> vector<2x1x1xf32>
    %114 = vector.broadcast %113 : vector<2x1x1xf32> to vector<2x1x8xf32>
    %115 = arith.mulf %110, %114 : vector<2x1x8xf32>
    %116 = vector.shape_cast %115 : vector<2x1x8xf32> to vector<2x8xf32>
    %c0_71 = arith.constant 0 : index
    %c0_72 = arith.constant 0 : index
    %c0_73 = arith.constant 0 : index
    %117 = vector.load %arg27[%c0_71, %c0_72, %c0_73] : memref<2x2x8xf32, #tpu.memory_space<vmem>>, vector<1x2x8xf32>
    %118 = vector.shape_cast %117 : vector<1x2x8xf32> to vector<2x8xf32>
    %119 = vector.shape_cast %116 : vector<2x8xf32> to vector<1x2x8xf32>
    tpu.vector_store %arg27[%c0_71, %c0_72, %c0_73], %119 {strides = array<i32>} : memref<2x2x8xf32, #tpu.memory_space<vmem>>, vector<1x2x8xf32>,
    "tpu.trace_start"() <{level = 10 : i32, message = "bqn,bnd->bqd"}> : () -> ()
    %cst_74 = arith.constant dense<0.000000e+00> : vector<2x1x24xf32>
    %120 = tpu.matmul %115, %100, %cst_74 {dimension_numbers = #tpu.dot_dimension_numbers<[2], [1], [1], [2], [0, 0, 0, 1, 1, 2], [0], [0]>} : vector<2x1x8xf32>, vector<2x8x24xf32>, vector<2x1x24xf32> -> vector<2x1x24xf32>
    "tpu.trace_stop"() : () -> ()
    %121 = vector.shape_cast %120 : vector<2x1x24xf32> to vector<2x24xf32>
    %c0_75 = arith.constant 0 : index
    %c0_76 = arith.constant 0 : index
    %c0_77 = arith.constant 0 : index
    %122 = vector.load %arg17[%c0_75, %c0_76, %c0_77] : memref<2x24x48xf32, #tpu.memory_space<vmem>>, vector<1x24x48xf32>
    %123 = vector.shape_cast %122 : vector<1x24x48xf32> to vector<24x48xf32>
    %cst_78 = arith.constant dense<0.000000e+00> : vector<2x48xf32>
    %124 = tpu.matmul %121, %123, %cst_78 {dimension_numbers = #tpu.dot_dimension_numbers<[1], [0], [0], [1], [0, 0, 1, 1], [], []>} : vector<2x24xf32>, vector<24x48xf32>, vector<2x48xf32> -> vector<2x48xf32>
    %125 = arith.addf %96, %124 : vector<2x48xf32>
    %126 = vector.extract_strided_slice %77 {offsets = [0, 24], sizes = [2, 24], strides = [1, 1]} : vector<2x48xf32> to vector<2x24xf32>
    %127 = vector.shape_cast %126 : vector<2x24xf32> to vector<2x1x24xf32>
    %128 = vector.extract_strided_slice %91 {offsets = [0, 0, 24], sizes = [2, 8, 24], strides = [1, 1, 1]} : vector<2x8x48xf32> to vector<2x8x24xf32>
    %129 = vector.extract_strided_slice %92 {offsets = [0, 0, 24], sizes = [2, 8, 24], strides = [1, 1, 1]} : vector<2x8x48xf32> to vector<2x8x24xf32>
    "tpu.trace_start"() <{level = 10 : i32, message = "bqk,bnk->bqn"}> : () -> ()
    %cst_79 = arith.constant dense<0.000000e+00> : vector<2x1x8xf32>
    %130 = tpu.matmul %127, %128, %cst_79 {dimension_numbers = #tpu.dot_dimension_numbers<[2], [2], [1], [1], [0, 0, 0, 1, 1, 1], [0], [0]>} : vector<2x1x24xf32>, vector<2x8x24xf32>, vector<2x1x8xf32> -> vector<2x1x8xf32>
    "tpu.trace_stop"() : () -> ()
    %cst_80 = arith.constant 0.204124153 : f32
    %131 = vector.broadcast %cst_80 : f32 to vector<2x1x8xf32>
    %132 = arith.mulf %130, %131 : vector<2x1x8xf32>
    %cst_81 = arith.constant -1.000000e+10 : f32
    %133 = vector.broadcast %cst_81 : f32 to vector<2x1x8xf32>
    %134 = arith.select %95, %133, %132 : vector<2x1x8xi1>, vector<2x1x8xf32>
    %cst_82 = arith.constant dense<0xFF800000> : vector<2x1xf32>
    %135 = vector.multi_reduction <maximumf>, %134, %cst_82 [2] : vector<2x1x8xf32> to vector<2x1xf32>
    %136 = vector.shape_cast %135 : vector<2x1xf32> to vector<2x1x1xf32>
    %137 = vector.broadcast %136 : vector<2x1x1xf32> to vector<2x1x8xf32>
    %138 = arith.subf %134, %137 : vector<2x1x8xf32>
    %139 = math.exp %138 : vector<2x1x8xf32>
    %cst_83 = arith.constant dense<0.000000e+00> : vector<2x1xf32>
    %140 = vector.multi_reduction <add>, %139, %cst_83 [2] : vector<2x1x8xf32> to vector<2x1xf32>
    %141 = vector.shape_cast %140 : vector<2x1xf32> to vector<2x1x1xf32>
    %142 = tpu.reciprocal %141 : vector<2x1x1xf32> -> vector<2x1x1xf32>
    %143 = vector.broadcast %142 : vector<2x1x1xf32> to vector<2x1x8xf32>
    %144 = arith.mulf %139, %143 : vector<2x1x8xf32>
    %145 = vector.shape_cast %144 : vector<2x1x8xf32> to vector<2x8xf32>
    %c1_84 = arith.constant 1 : index
    %c0_85 = arith.constant 0 : index
    %c0_86 = arith.constant 0 : index
    %146 = vector.load %arg27[%c1_84, %c0_85, %c0_86] : memref<2x2x8xf32, #tpu.memory_space<vmem>>, vector<1x2x8xf32>
    %147 = vector.shape_cast %146 : vector<1x2x8xf32> to vector<2x8xf32>
    %148 = vector.shape_cast %145 : vector<2x8xf32> to vector<1x2x8xf32>
    tpu.vector_store %arg27[%c1_84, %c0_85, %c0_86], %148 {strides = array<i32>} : memref<2x2x8xf32, #tpu.memory_space<vmem>>, vector<1x2x8xf32>,
    "tpu.trace_start"() <{level = 10 : i32, message = "bqn,bnd->bqd"}> : () -> ()
    %cst_87 = arith.constant dense<0.000000e+00> : vector<2x1x24xf32>
    %149 = tpu.matmul %144, %129, %cst_87 {dimension_numbers = #tpu.dot_dimension_numbers<[2], [1], [1], [2], [0, 0, 0, 1, 1, 2], [0], [0]>} : vector<2x1x8xf32>, vector<2x8x24xf32>, vector<2x1x24xf32> -> vector<2x1x24xf32>
    "tpu.trace_stop"() : () -> ()
    %150 = vector.shape_cast %149 : vector<2x1x24xf32> to vector<2x24xf32>
    %c1_88 = arith.constant 1 : index
    %c0_89 = arith.constant 0 : index
    %c0_90 = arith.constant 0 : index
    %151 = vector.load %arg17[%c1_88, %c0_89, %c0_90] : memref<2x24x48xf32, #tpu.memory_space<vmem>>, vector<1x24x48xf32>
    %152 = vector.shape_cast %151 : vector<1x24x48xf32> to vector<24x48xf32>
    %cst_91 = arith.constant dense<0.000000e+00> : vector<2x48xf32>
    %153 = tpu.matmul %150, %152, %cst_91 {dimension_numbers = #tpu.dot_dimension_numbers<[1], [0], [0], [1], [0, 0, 1, 1], [], []>} : vector<2x24xf32>, vector<24x48xf32>, vector<2x48xf32> -> vector<2x48xf32>
    %154 = arith.addf %125, %153 : vector<2x48xf32>
    %c0_92 = arith.constant 0 : index
    %c0_93 = arith.constant 0 : index
    %155 = vector.load %arg18[%c0_92, %c0_93] : memref<1x48xf32, #tpu.memory_space<vmem>>, vector<1x48xf32>
    %156 = vector.broadcast %155 : vector<1x48xf32> to vector<2x48xf32>
    %157 = arith.addf %154, %156 : vector<2x48xf32>
    %cst_94 = arith.constant 0.000000e+00 : f32
    %158 = vector.broadcast %cst_94 : f32 to vector<2x16xf32>
    %159 = tpu.concatenate %0, %158, %1 in 1 : vector<2x16xf32>, vector<2x16xf32>, vector<2x16xf32> -> vector<2x48xf32>
    %160 = arith.addf %157, %159 : vector<2x48xf32>
    %cst_95 = arith.constant dense<0.000000e+00> : vector<2xf32>
    %161 = vector.multi_reduction <add>, %160, %cst_95 [1] : vector<2x48xf32> to vector<2xf32>
    %162 = vector.shape_cast %161 : vector<2xf32> to vector<2x1xf32>
    %cst_96 = arith.constant 4.800000e+01 : f32
    %163 = vector.broadcast %cst_96 : f32 to vector<2x1xf32>
    %164 = arith.divf %162, %163 : vector<2x1xf32>
    %165 = vector.broadcast %164 : vector<2x1xf32> to vector<2x48xf32>
    %166 = arith.subf %160, %165 : vector<2x48xf32>
    %167 = arith.mulf %166, %166 : vector<2x48xf32>
    %cst_97 = arith.constant dense<0.000000e+00> : vector<2xf32>
    %168 = vector.multi_reduction <add>, %167, %cst_97 [1] : vector<2x48xf32> to vector<2xf32>
    %169 = vector.shape_cast %168 : vector<2xf32> to vector<2x1xf32>
    %cst_98 = arith.constant 4.800000e+01 : f32
    %170 = vector.broadcast %cst_98 : f32 to vector<2x1xf32>
    %171 = arith.divf %169, %170 : vector<2x1xf32>
    %172 = vector.broadcast %164 : vector<2x1xf32> to vector<2x48xf32>
    %173 = arith.subf %160, %172 : vector<2x48xf32>
    %cst_99 = arith.constant 9.99999974E-6 : f32
    %174 = vector.broadcast %cst_99 : f32 to vector<2x1xf32>
    %175 = arith.addf %171, %174 : vector<2x1xf32>
    %176 = math.rsqrt %175 : vector<2x1xf32>
    %177 = vector.broadcast %176 : vector<2x1xf32> to vector<2x48xf32>
    %178 = arith.mulf %173, %177 : vector<2x48xf32>
    %c0_100 = arith.constant 0 : index
    %c0_101 = arith.constant 0 : index
    %179 = vector.load %arg19[%c0_100, %c0_101] : memref<1x48xf32, #tpu.memory_space<vmem>>, vector<1x48xf32>
    %180 = vector.broadcast %179 : vector<1x48xf32> to vector<2x48xf32>
    %181 = arith.mulf %178, %180 : vector<2x48xf32>
    %c0_102 = arith.constant 0 : index
    %c0_103 = arith.constant 0 : index
    %182 = vector.load %arg20[%c0_102, %c0_103] : memref<1x48xf32, #tpu.memory_space<vmem>>, vector<1x48xf32>
    %183 = vector.broadcast %182 : vector<1x48xf32> to vector<2x48xf32>
    %184 = arith.addf %181, %183 : vector<2x48xf32>
    %c0_104 = arith.constant 0 : index
    %c0_105 = arith.constant 0 : index
    %185 = vector.load %arg21[%c0_104, %c0_105] : memref<48x16xf32, #tpu.memory_space<vmem>>, vector<48x16xf32>
    %cst_106 = arith.constant dense<0.000000e+00> : vector<2x16xf32>
    %186 = tpu.matmul %184, %185, %cst_106 {dimension_numbers = #tpu.dot_dimension_numbers<[1], [0], [0], [1], [0, 0, 1, 1], [], []>} : vector<2x48xf32>, vector<48x16xf32>, vector<2x16xf32> -> vector<2x16xf32>
    %c0_107 = arith.constant 0 : index
    %c0_108 = arith.constant 0 : index
    %187 = vector.load %arg22[%c0_107, %c0_108] : memref<16x16xf32, #tpu.memory_space<vmem>>, vector<16x16xf32>
    %cst_109 = arith.constant dense<0.000000e+00> : vector<2x16xf32>
    %188 = tpu.matmul %0, %187, %cst_109 {dimension_numbers = #tpu.dot_dimension_numbers<[1], [0], [0], [1], [0, 0, 1, 1], [], []>} : vector<2x16xf32>, vector<16x16xf32>, vector<2x16xf32> -> vector<2x16xf32>
    %189 = arith.addf %186, %188 : vector<2x16xf32>
    %c0_110 = arith.constant 0 : index
    %c0_111 = arith.constant 0 : index
    %190 = vector.load %arg23[%c0_110, %c0_111] : memref<1x16xf32, #tpu.memory_space<vmem>>, vector<1x16xf32>
    %191 = vector.broadcast %190 : vector<1x16xf32> to vector<2x16xf32>
    %192 = arith.addf %189, %191 : vector<2x16xf32>
    %cst_112 = arith.constant 0.000000e+00 : f32
    %193 = vector.broadcast %cst_112 : f32 to vector<2x16xf32>
    %194 = arith.maximumf %192, %193 : vector<2x16xf32>
    %c0_113 = arith.constant 0 : index
    %c0_114 = arith.constant 0 : index
    %195 = vector.load %arg24[%c0_113, %c0_114] : memref<16x16xf32, #tpu.memory_space<vmem>>, vector<16x16xf32>
    %cst_115 = arith.constant dense<0.000000e+00> : vector<2x16xf32>
    %196 = tpu.matmul %194, %195, %cst_115 {dimension_numbers = #tpu.dot_dimension_numbers<[1], [0], [0], [1], [0, 0, 1, 1], [], []>} : vector<2x16xf32>, vector<16x16xf32>, vector<2x16xf32> -> vector<2x16xf32>
    %c0_116 = arith.constant 0 : index
    %c0_117 = arith.constant 0 : index
    %197 = vector.load %arg25[%c0_116, %c0_117] : memref<1x16xf32, #tpu.memory_space<vmem>>, vector<1x16xf32>
    %198 = vector.broadcast %197 : vector<1x16xf32> to vector<2x16xf32>
    %199 = arith.addf %196, %198 : vector<2x16xf32>
    %c0_118 = arith.constant 0 : index
    %c0_119 = arith.constant 0 : index
    %200 = vector.load %arg26[%c0_118, %c0_119] : memref<2x16xf32, #tpu.memory_space<vmem>>, vector<2x16xf32>
    tpu.vector_store %arg26[%c0_118, %c0_119], %199 {strides = array<i32>} : memref<2x16xf32, #tpu.memory_space<vmem>>, vector<2x16xf32>,
    return
  }
  func.func @transform_0(%arg0: i32) -> (i32, i32) {
    %c0_i32 = arith.constant 0 : i32
    %c0_i32_0 = arith.constant 0 : i32
    return %arg0, %c0_i32 : i32, i32
  }
  func.func @transform_1(%arg0: i32) -> (i32, i32) {
    %c0_i32 = arith.constant 0 : i32
    %c0_i32_0 = arith.constant 0 : i32
    return %arg0, %c0_i32 : i32, i32
  }
  func.func @transform_2(%arg0: i32) -> (i32, i32) {
    %c0_i32 = arith.constant 0 : i32
    %c0_i32_0 = arith.constant 0 : i32
    return %arg0, %c0_i32 : i32, i32
  }
  func.func @transform_3(%arg0: i32) -> (i32, i32) {
    %c0_i32 = arith.constant 0 : i32
    %c0_i32_0 = arith.constant 0 : i32
    return %arg0, %c0_i32 : i32, i32
  }
  func.func @transform_4(%arg0: i32) -> (i32, i32) {
    %c0_i32 = arith.constant 0 : i32
    %c0_i32_0 = arith.constant 0 : i32
    return %arg0, %c0_i32 : i32, i32
  }
  func.func @transform_5(%arg0: i32) -> (i32, i32) {
    %c0_i32 = arith.constant 0 : i32
    %c0_i32_0 = arith.constant 0 : i32
    return %arg0, %c0_i32 : i32, i32
  }
  func.func @transform_6(%arg0: i32) -> (i32, i32, i32) {
    %c0_i32 = arith.constant 0 : i32
    %c0_i32_0 = arith.constant 0 : i32
    %c0_i32_1 = arith.constant 0 : i32
    %c0_i32_2 = arith.constant 0 : i32
    return %c0_i32, %c0_i32_0, %c0_i32_1 : i32, i32, i32
  }
  func.func @transform_7(%arg0: i32) -> (i32, i32, i32) {
    %c0_i32 = arith.constant 0 : i32
    %c0_i32_0 = arith.constant 0 : i32
    %c0_i32_1 = arith.constant 0 : i32
    %c0_i32_2 = arith.constant 0 : i32
    return %c0_i32, %c0_i32_0, %c0_i32_1 : i32, i32, i32
  }
  func.func @transform_8(%arg0: i32) -> (i32, i32) {
    %c0_i32 = arith.constant 0 : i32
    %c0_i32_0 = arith.constant 0 : i32
    %c0_i32_1 = arith.constant 0 : i32
    return %c0_i32, %c0_i32_0 : i32, i32
  }
  func.func @transform_9(%arg0: i32) -> (i32, i32) {
    %c0_i32 = arith.constant 0 : i32
    %c0_i32_0 = arith.constant 0 : i32
    %c0_i32_1 = arith.constant 0 : i32
    return %c0_i32, %c0_i32_0 : i32, i32
  }
  func.func @transform_10(%arg0: i32) -> (i32, i32) {
    %c0_i32 = arith.constant 0 : i32
    %c0_i32_0 = arith.constant 0 : i32
    %c0_i32_1 = arith.constant 0 : i32
    return %c0_i32, %c0_i32_0 : i32, i32
  }
  func.func @transform_11(%arg0: i32) -> (i32, i32) {
    %c0_i32 = arith.constant 0 : i32
    %c0_i32_0 = arith.constant 0 : i32
    %c0_i32_1 = arith.constant 0 : i32
    return %c0_i32, %c0_i32_0 : i32, i32
  }
  func.func @transform_12(%arg0: i32) -> (i32, i32) {
    %c0_i32 = arith.constant 0 : i32
    %c0_i32_0 = arith.constant 0 : i32
    %c0_i32_1 = arith.constant 0 : i32
    return %c0_i32, %c0_i32_0 : i32, i32
  }
  func.func @transform_13(%arg0: i32) -> (i32, i32) {
    %c0_i32 = arith.constant 0 : i32
    %c0_i32_0 = arith.constant 0 : i32
    %c0_i32_1 = arith.constant 0 : i32
    return %c0_i32, %c0_i32_0 : i32, i32
  }
  func.func @transform_14(%arg0: i32) -> (i32, i32) {
    %c0_i32 = arith.constant 0 : i32
    %c0_i32_0 = arith.constant 0 : i32
    %c0_i32_1 = arith.constant 0 : i32
    return %c0_i32, %c0_i32_0 : i32, i32
  }
  func.func @transform_15(%arg0: i32) -> (i32, i32) {
    %c0_i32 = arith.constant 0 : i32
    %c0_i32_0 = arith.constant 0 : i32
    %c0_i32_1 = arith.constant 0 : i32
    return %c0_i32, %c0_i32_0 : i32, i32
  }
  func.func @transform_16(%arg0: i32) -> (i32, i32, i32) {
    %c0_i32 = arith.constant 0 : i32
    %c0_i32_0 = arith.constant 0 : i32
    %c0_i32_1 = arith.constant 0 : i32
    %c0_i32_2 = arith.constant 0 : i32
    return %c0_i32, %c0_i32_0, %c0_i32_1 : i32, i32, i32
  }
  func.func @transform_17(%arg0: i32) -> (i32, i32) {
    %c0_i32 = arith.constant 0 : i32
    %c0_i32_0 = arith.constant 0 : i32
    %c0_i32_1 = arith.constant 0 : i32
    return %c0_i32, %c0_i32_0 : i32, i32
  }
  func.func @transform_18(%arg0: i32) -> (i32, i32) {
    %c0_i32 = arith.constant 0 : i32
    %c0_i32_0 = arith.constant 0 : i32
    %c0_i32_1 = arith.constant 0 : i32
    return %c0_i32, %c0_i32_0 : i32, i32
  }
  func.func @transform_19(%arg0: i32) -> (i32, i32) {
    %c0_i32 = arith.constant 0 : i32
    %c0_i32_0 = arith.constant 0 : i32
    %c0_i32_1 = arith.constant 0 : i32
    return %c0_i32, %c0_i32_0 : i32, i32
  }
  func.func @transform_20(%arg0: i32) -> (i32, i32) {
    %c0_i32 = arith.constant 0 : i32
    %c0_i32_0 = arith.constant 0 : i32
    %c0_i32_1 = arith.constant 0 : i32
    return %c0_i32, %c0_i32_0 : i32, i32
  }
  func.func @transform_21(%arg0: i32) -> (i32, i32) {
    %c0_i32 = arith.constant 0 : i32
    %c0_i32_0 = arith.constant 0 : i32
    %c0_i32_1 = arith.constant 0 : i32
    return %c0_i32, %c0_i32_0 : i32, i32
  }
  func.func @transform_22(%arg0: i32) -> (i32, i32) {
    %c0_i32 = arith.constant 0 : i32
    %c0_i32_0 = arith.constant 0 : i32
    %c0_i32_1 = arith.constant 0 : i32
    return %c0_i32, %c0_i32_0 : i32, i32
  }
  func.func @transform_23(%arg0: i32) -> (i32, i32) {
    %c0_i32 = arith.constant 0 : i32
    %c0_i32_0 = arith.constant 0 : i32
    %c0_i32_1 = arith.constant 0 : i32
    return %c0_i32, %c0_i32_0 : i32, i32
  }
  func.func @transform_24(%arg0: i32) -> (i32, i32) {
    %c0_i32 = arith.constant 0 : i32
    %c0_i32_0 = arith.constant 0 : i32
    %c0_i32_1 = arith.constant 0 : i32
    return %c0_i32, %c0_i32_0 : i32, i32
  }
  func.func @transform_25(%arg0: i32) -> (i32, i32) {
    %c0_i32 = arith.constant 0 : i32
    %c0_i32_0 = arith.constant 0 : i32
    return %arg0, %c0_i32 : i32, i32
  }
  func.func @transform_26(%arg0: i32) -> (i32, i32, i32) {
    %c0_i32 = arith.constant 0 : i32
    %c0_i32_0 = arith.constant 0 : i32
    %c0_i32_1 = arith.constant 0 : i32
    return %c0_i32, %arg0, %c0_i32_0 : i32, i32, i32
  }
}

</mosaic_0001>

<bundles_post_ra>
// kernel: tpu_custom_call.1
= control target key start
LH: loop header
LB: loop body
LE: loop exit
PB: predicated region body
PF: predicated region fallthrough
CT: control target
= control target key end

     0   :  { %s4075_s0 = inlined_call_operand.hbm [shape: f32[2,16], index: 0, kind: input, shape index: {}]   ;;  %s4076_s1 = inlined_call_operand.hbm [shape: f32[2,16], index: 1, kind: input, shape index: {}]   ;;  %s4077_s2 = inlined_call_operand.hbm [shape: f32[16,16], index: 2, kind: input, shape index: {}]   ;;  %s4078_s3 = inlined_call_operand.hbm [shape: f32[16,16], index: 3, kind: input, shape index: {}]   ;;  %s4079_s4 = inlined_call_operand.hbm [shape: f32[16,16], index: 4, kind: input, shape index: {}]   ;;  %s4080_s5 = inlined_call_operand.hbm [shape: f32[2,8], index: 5, kind: input, shape index: {}]   ;;  %s4081_s6 = inlined_call_operand.vmem [shape: f32[3,16,32], index: 6, kind: input, shape index: {}]   ;;  %s4082_s7 = inlined_call_operand.hbm [shape: f32[3,16,32], index: 7, kind: input, shape index: {}]   ;;  %s4083_s8 = inlined_call_operand.hbm [shape: f32[1,32], index: 8, kind: input, shape index: {}]   ;;  %s4084_s9 = inlined_call_operand.hbm [shape: f32[16,48], index: 9, kind: input, shape index: {}]   ;;  %s4085_s10 = inlined_call_operand.hbm [shape: f32[16,48], index: 10, kind: input, shape index: {}]   ;;  %s4086_s11 = inlined_call_operand.vmem [shape: f32[32,48], index: 11, kind: input, shape index: {}]   ;;  %s4087_s12 = inlined_call_operand.hbm [shape: f32[16,48], index: 12, kind: input, shape index: {}]   ;;  %s4088_s13 = inlined_call_operand.hbm [shape: f32[16,48], index: 13, kind: input, shape index: {}]   ;;  %s4089_s14 = inlined_call_operand.hbm [shape: f32[16,48], index: 14, kind: input, shape index: {}]   ;;  %s4090_s15 = inlined_call_operand.hbm [shape: f32[16,48], index: 15, kind: input, shape index: {}]   ;;  %s4091_s16 = inlined_call_operand.hbm [shape: f32[2,24,48], index: 16, kind: input, shape index: {}]   ;;  %s4092_s17 = inlined_call_operand.hbm [shape: f32[1,48], index: 17, kind: input, shape index: {}]   ;;  %s4093_s18 = inlined_call_operand.hbm [shape: f32[1,48], index: 18, kind: input, shape index: {}]   ;;  %s4094_s19 = inlined_call_operand.vmem [shape: f32[1,48], index: 19, kind: input, shape index: {}]   ;;  %s4095_s20 = inlined_call_operand.vmem [shape: f32[48,16], index: 20, kind: input, shape index: {}]   ;;  %s4096_s21 = inlined_call_operand.hbm [shape: f32[16,16], index: 21, kind: input, shape index: {}]   ;;  %s4097_s22 = inlined_call_operand.vmem [shape: f32[1,16], index: 22, kind: input, shape index: {}]   ;;  %s4098_s23 = inlined_call_operand.hbm [shape: f32[16,16], index: 23, kind: input, shape index: {}]   ;;  %s4099_s24 = inlined_call_operand.vmem [shape: f32[1,16], index: 24, kind: input, shape index: {}]   ;;  %s4100_s25 = inlined_call_operand.hbm [shape: f32[2,16], index: 25, kind: output, shape index: {0}]   ;;  %s4101_s26 = inlined_call_operand.hbm [shape: f32[2,2,8], index: 26, kind: output, shape index: {1}]  }
   0x1   :  { %4103 = sst [smem:[#allocation47_spill]] %s4075_s0 }
   0x2   :  { %4104 = sst [smem:[#allocation48_spill]] %s4076_s1 }
   0x3   :  { %4105 = sst [smem:[#allocation49_spill]] %s4077_s2 }
   0x4   :  { %4106 = sst [smem:[#allocation50_spill]] %s4078_s3 }
   0x5   :  { %4107 = sst [smem:[#allocation51_spill]] %s4079_s4 }
   0x6   :  { %4108 = sst [smem:[#allocation52_spill]] %s4080_s5 }
   0x7   :  { %4109 = sst [smem:[#allocation53_spill]] %s4081_s6 }
   0x8   :  { %4110 = sst [smem:[#allocation54_spill]] %s4082_s7 }
   0x9   :  { %4111 = sst [smem:[#allocation55_spill]] %s4083_s8 }
   0xa   :  { %4112 = sst [smem:[#allocation56_spill]] %s4084_s9 }
   0xb   :  { %4113 = sst [smem:[#allocation57_spill]] %s4085_s10 }
   0xc   :  { %4114 = sst [smem:[#allocation58_spill]] %s4100_s25 }
   0xd   :  { %32 = vsyncpa [#allocation3], 0 }
   0xe   :  { %33 = vsyncpa [#allocation6], 0 }
   0xf   :  { %34 = vsyncpa [#allocation9], 0 }
  0x10   :  { %35 = vsyncpa [#allocation12], 0 }
  0x11   :  { %36 = vsyncpa [#allocation15], 0 }
  0x12   :  { %37 = vsyncpa [#allocation18], 0 }
  0x13   :  { %38 = vsyncpa [#allocation21], 0 }
  0x14   :  { %39 = vsyncpa [#allocation24], 0 }
  0x15   :  { %40 = vsyncpa [#allocation27], 0 }
  0x16   :  { %41 = vsyncpa [#allocation30], 0 }
  0x17   :  { %42 = vsyncpa [#allocation4], 0 }
  0x18   :  { %43 = vsyncpa [#allocation34], 0  ;;  %s3544_s27 = smov [#allocation5]  }
  0x19   :  { %s60_s3 = sshll.u32 %s3544_s27, 4  ;;  %s61_s3 = int_to_ptr.vmem [resolvable:$true] %s60_s3 }
  0x1a   :  { %s3108_s7 = scalar_lea.vmem %s61_s3, 32  ;;  %p3113_p1 = scmp.lt.s32.totalorder %s61_s3, %s61_s3 }
  0x1b   :  { %p3109_p0 = scmp.ne.s32.totalorder %s61_s3, %s3108_s7  ;;  %p3114_p2 = scmp.lt.s32.totalorder %s3108_s7, %s3108_s7 }
  0x1d   :  { %p3115_p3 = por %p3114_p2, %p3113_p1 }
  0x1f   :  { %p3116_p4 = pnand %p3115_p3, %p3109_p0 }
  0x21   :  { %3119 = shalt.err (!%p3116_p4)
}
  0x22   :  { %s4115_s4 = sld [smem:[#allocation48_spill]]  ;;  %s3545_s29 = smov [#allocation8]  }
  0x23   :  { %s81_s0 = sshll.u32 %s3545_s29, 4  ;;  %s3546_s9 = smov [#allocation11]   ;;  %s82_s0 = int_to_ptr.vmem [resolvable:$true] %s81_s0 }
  0x24   :  { %s106_s30 = sshll.u32 %s3546_s9, 4  ;;  %s3128_s2 = scalar_lea.vmem %s82_s0, 256  ;;  %s107_s30 = int_to_ptr.vmem [resolvable:$true] %s106_s30 }
  0x25   :  { %p3129_p5 = scmp.ne.s32.totalorder %s82_s0, %s3128_s2  ;;  %p3133_p6 = scmp.lt.s32.totalorder %s82_s0, %s82_s0 }
  0x26   :  { %p3134_p7 = scmp.lt.s32.totalorder %s3128_s2, %s3128_s2 }
  0x28   :  { %63 = dma.hbm_to_vmem [thread:$0]  %s4115_s4, 32, %s61_s3, [#allocation6]  }
  0x29   :  { %p3135_p8 = por %p3134_p7, %p3133_p6 }
  0x2b   :  { %p3136_p9 = pnand %p3135_p8, %p3129_p5 }
  0x2d   :  { %3139 = shalt.err (!%p3136_p9)
}
  0x2e   :  { %s3547_s5 = smov 128   ;;  %s3548_s10 = smov 8  }
  0x2f   :  { %s4116_s27 = sld [smem:[#allocation50_spill]]  ;;  %s3148_s3 = scalar_lea.vmem %s107_s30, 32 }
  0x30   :  { %p3149_p10 = scmp.ne.s32.totalorder %s107_s30, %s3148_s3  ;;  %p3153_p11 = scmp.lt.s32.totalorder %s107_s30, %s107_s30 }
  0x31   :  { %p3154_p12 = scmp.lt.s32.totalorder %s3148_s3, %s3148_s3 }
  0x33   :  { %p3155_p13 = por %p3154_p12, %p3153_p11 }
  0x35   :  { %87 = dma.hbm_to_vmem [thread:$0]  %s4116_s27, 256, %s82_s0, [#allocation9], %s3547_s5, %s3547_s5, %s3548_s10  }
  0x36   :  { %p3156_p0 = pnand %p3155_p13, %p3149_p10 }
  0x38   :  { %3159 = shalt.err (!%p3156_p0)
}
  0x39   :  { %s4117_s8 = sld [smem:[#allocation52_spill]]  ;;  %s3549_s4 = smov [#allocation14]  }
  0x3a   :  { %s130_s29 = sshll.u32 %s3549_s4, 4  ;;  %s3550_s9 = smov [#allocation17]   ;;  %s131_s29 = int_to_ptr.vmem [resolvable:$true] %s130_s29 }
  0x3b   :  { %s151_s2 = sshll.u32 %s3550_s9, 4  ;;  %s3168_s25 = scalar_lea.vmem %s131_s29, 16  ;;  %s152_s2 = int_to_ptr.vmem [resolvable:$true] %s151_s2 }
  0x3c   :  { %p3169_p1 = scmp.ne.s32.totalorder %s131_s29, %s3168_s25  ;;  %s3172_s0 = scalar_lea.vmem %s131_s29, 32 }
  0x3d   :  { %p3173_p2 = scmp.lt.s32.totalorder %s131_s29, %s131_s29  ;;  %p3174_p3 = scmp.lt.s32.totalorder %s3172_s0, %s3168_s25 }
  0x3f   :  { %109 = dma.hbm_to_vmem [thread:$0]  %s4117_s8, 32, %s107_s30, [#allocation12]  }
  0x40   :  { %p3175_p4 = por %p3174_p3, %p3173_p2 }
  0x42   :  { %p3176_p5 = pnand %p3175_p4, %p3169_p1 }
  0x44   :  { %3179 = shalt.err (!%p3176_p5)
}
  0x45   :  { %s4118_s27 = sld [smem:[#allocation55_spill]]  ;;  %s3188_s3 = scalar_lea.vmem %s152_s2, 256 }
  0x46   :  { %p3189_p6 = scmp.ne.s32.totalorder %s152_s2, %s3188_s3  ;;  %p3193_p7 = scmp.lt.s32.totalorder %s152_s2, %s152_s2 }
  0x47   :  { %p3194_p8 = scmp.lt.s32.totalorder %s3188_s3, %s3188_s3 }
  0x49   :  { %p3195_p9 = por %p3194_p8, %p3193_p7 }
  0x4b   :  { %133 = dma.hbm_to_vmem [thread:$0]  %s4118_s27, 16, %s131_s29, [#allocation15]  }
  0x4c   :  { %p3196_p10 = pnand %p3195_p9, %p3189_p6 }
  0x4e   :  { %3199 = shalt.err (!%p3196_p10)
}
  0x4f   :  { %s4119_s7 = sld [smem:[#allocation57_spill]]  ;;  %s3551_s28 = smov [#allocation20]  }
  0x50   :  { %s177_s8 = sshll.u32 %s3551_s28, 4  ;;  %s3552_s4 = smov [#allocation23]   ;;  %s178_s8 = int_to_ptr.vmem [resolvable:$true] %s177_s8 }
  0x51   :  { %s201_s29 = sshll.u32 %s3552_s4, 4  ;;  %s3208_s9 = scalar_lea.vmem %s178_s8, 256  ;;  %s202_s29 = int_to_ptr.vmem [resolvable:$true] %s201_s29 }
  0x52   :  { %p3209_p11 = scmp.ne.s32.totalorder %s178_s8, %s3208_s9  ;;  %p3213_p12 = scmp.lt.s32.totalorder %s178_s8, %s178_s8 }
  0x53   :  { %p3214_p13 = scmp.lt.s32.totalorder %s3208_s9, %s3208_s9 }
  0x55   :  { %157 = dma.hbm_to_vmem [thread:$0]  %s4119_s7, 256, %s152_s2, [#allocation18], %s3547_s5, %s3547_s5, %s3548_s10  }
  0x56   :  { %p3215_p0 = por %p3214_p13, %p3213_p12 }
  0x58   :  { %p3216_p1 = pnand %p3215_p0, %p3209_p11 }
  0x5a   :  { %3219 = shalt.err (!%p3216_p1)
}
  0x5b   :  { %183 = dma.hbm_to_vmem [thread:$0]  %s4088_s13, 256, %s178_s8, [#allocation21], %s3547_s5, %s3547_s5, %s3548_s10  }
  0x5c   :  { %s3228_s2 = scalar_lea.vmem %s202_s29, 256  ;;  %p3233_p3 = scmp.lt.s32.totalorder %s202_s29, %s202_s29 }
  0x5d   :  { %p3229_p2 = scmp.ne.s32.totalorder %s202_s29, %s3228_s2  ;;  %p3234_p4 = scmp.lt.s32.totalorder %s3228_s2, %s3228_s2 }
  0x5f   :  { %p3235_p5 = por %p3234_p4, %p3233_p3 }
  0x61   :  { %p3236_p6 = pnand %p3235_p5, %p3229_p2 }
  0x63   :  { %3239 = shalt.err (!%p3236_p6)
}
  0x64   :  { %207 = dma.hbm_to_vmem [thread:$0]  %s4090_s15, 256, %s202_s29, [#allocation24], %s3547_s5, %s3547_s5, %s3548_s10  }
  0x65   :  { %s3553_s3 = smov [#allocation26]   ;;  %s3554_s25 = smov [#allocation29]  }
  0x66   :  { %s226_s30 = sshll.u32 %s3553_s3, 4  ;;  %s249_s13 = sshll.u32 %s3554_s25, 4  ;;  %s227_s30 = int_to_ptr.vmem [resolvable:$true] %s226_s30  ;;  %s250_s13 = int_to_ptr.vmem [resolvable:$true] %s249_s13 }
  0x67   :  { %s3248_s7 = scalar_lea.vmem %s227_s30, 16  ;;  %s3252_s28 = scalar_lea.vmem %s227_s30, 32 }
  0x68   :  { %p3249_p7 = scmp.ne.s32.totalorder %s227_s30, %s3248_s7  ;;  %p3253_p8 = scmp.lt.s32.totalorder %s227_s30, %s227_s30 }
  0x69   :  { %p3254_p9 = scmp.lt.s32.totalorder %s3252_s28, %s3248_s7 }
  0x6b   :  { %p3255_p10 = por %p3254_p9, %p3253_p8 }
  0x6d   :  { %p3256_p11 = pnand %p3255_p10, %p3249_p7 }
  0x6f   :  { %3259 = shalt.err (!%p3256_p11)
}
  0x70   :  { %229 = dma.hbm_to_vmem [thread:$0]  %s4092_s17, 16, %s227_s30, [#allocation27]  }
  0x71   :  { %s3268_s9 = scalar_lea.vmem %s250_s13, 256  ;;  %p3273_p13 = scmp.lt.s32.totalorder %s250_s13, %s250_s13 }
  0x72   :  { %p3269_p12 = scmp.ne.s32.totalorder %s250_s13, %s3268_s9  ;;  %p3274_p0 = scmp.lt.s32.totalorder %s3268_s9, %s3268_s9 }
  0x74   :  { %p3275_p1 = por %p3274_p0, %p3273_p13 }
  0x76   :  { %p3276_p2 = pnand %p3275_p1, %p3269_p12 }
  0x78   :  { %3279 = shalt.err (!%p3276_p2)
}
  0x79   :  { %255 = dma.hbm_to_vmem [thread:$0]  %s4096_s21, 256, %s250_s13, [#allocation30], %s3547_s5, %s3547_s5, %s3548_s10  }
  0x7a   :  { %s3555_s0 = smov [#allocation2]   ;;  %s3556_s2 = smov [#allocation7]  }
  0x7b   :  { %s50_s6 = sshll.u32 %s3555_s0, 4  ;;  %s69_s17 = sshll.u32 %s3556_s2, 4  ;;  %s51_s6 = int_to_ptr.vmem [resolvable:$true] %s50_s6  ;;  %s70_s17 = int_to_ptr.vmem [resolvable:$true] %s69_s17 }
  0x7c   :  { %s3288_s1 = scalar_lea.vmem %s51_s6, 32  ;;  %p3293_p4 = scmp.lt.s32.totalorder %s51_s6, %s51_s6 }
  0x7d   :  { %p3289_p3 = scmp.ne.s32.totalorder %s51_s6, %s3288_s1  ;;  %p3294_p5 = scmp.lt.s32.totalorder %s3288_s1, %s3288_s1 }
  0x7f   :  { %p3295_p6 = por %p3294_p5, %p3293_p4 }
  0x81   :  { %p3296_p7 = pnand %p3295_p6, %p3289_p3 }
  0x83   :  { %3299 = shalt.err (!%p3296_p7)
}
  0x84   :  { %s4120_s30 = sld [smem:[#allocation47_spill]]  ;;  %s3308_s25 = scalar_lea.vmem %s70_s17, 256 }
  0x85   :  { %p3309_p8 = scmp.ne.s32.totalorder %s70_s17, %s3308_s25  ;;  %p3313_p9 = scmp.lt.s32.totalorder %s70_s17, %s70_s17 }
  0x86   :  { %p3314_p10 = scmp.lt.s32.totalorder %s3308_s25, %s3308_s25 }
  0x88   :  { %p3315_p11 = por %p3314_p10, %p3313_p9 }
  0x8a   :  { %53 = dma.hbm_to_vmem [thread:$0]  %s4120_s30, 32, %s51_s6, [#allocation3]  }
  0x8b   :  { %p3316_p12 = pnand %p3315_p11, %p3309_p8 }
  0x8d   :  { %3319 = shalt.err (!%p3316_p12)
}
  0x8e   :  { %s4121_s7 = sld [smem:[#allocation49_spill]]  ;;  %s3557_s28 = smov [#allocation10]  }
  0x8f   :  { %s93_s8 = sshll.u32 %s3557_s28, 4  ;;  %s3558_s4 = smov [#allocation13]   ;;  %s94_s8 = int_to_ptr.vmem [resolvable:$true] %s93_s8 }
  0x90   :  { %s117_s9 = sshll.u32 %s3558_s4, 4  ;;  %s3328_s15 = scalar_lea.vmem %s94_s8, 256  ;;  %s118_s9 = int_to_ptr.vmem [resolvable:$true] %s117_s9 }
  0x91   :  { %p3329_p13 = scmp.ne.s32.totalorder %s94_s8, %s3328_s15  ;;  %p3333_p0 = scmp.lt.s32.totalorder %s94_s8, %s94_s8 }
  0x92   :  { %p3334_p1 = scmp.lt.s32.totalorder %s3328_s15, %s3328_s15 }
  0x94   :  { %75 = dma.hbm_to_vmem [thread:$0]  %s4121_s7, 256, %s70_s17, [#allocation6], %s3547_s5, %s3547_s5, %s3548_s10  }
  0x95   :  { %p3335_p2 = por %p3334_p1, %p3333_p0 }
  0x97   :  { %p3336_p3 = pnand %p3335_p2, %p3329_p13 }
  0x99   :  { %3339 = shalt.err (!%p3336_p3)
}
  0x9a   :  { %s4122_s6 = sld [smem:[#allocation51_spill]]  ;;  %s3348_s2 = scalar_lea.vmem %s118_s9, 768 }
  0x9b   :  { %p3349_p4 = scmp.ne.s32.totalorder %s118_s9, %s3348_s2  ;;  %p3353_p5 = scmp.lt.s32.totalorder %s118_s9, %s118_s9 }
  0x9c   :  { %p3354_p6 = scmp.lt.s32.totalorder %s3348_s2, %s3348_s2 }
  0x9e   :  { %p3355_p7 = por %p3354_p6, %p3353_p5 }
  0xa0   :  { %99 = dma.hbm_to_vmem [thread:$0]  %s4122_s6, 256, %s94_s8, [#allocation9], %s3547_s5, %s3547_s5, %s3548_s10  }
  0xa1   :  { %p3356_p8 = pnand %p3355_p7, %p3349_p4 }
  0xa3   :  { %3359 = shalt.err (!%p3356_p8)
}
  0xa4   :  { %s4123_s27 = sld [smem:[#allocation54_spill]]  ;;  %s3559_s3 = smov [#allocation16]  }
  0xa5   :  { %s139_s30 = sshll.u32 %s3559_s3, 4  ;;  %s3560_s25 = smov [#allocation19]   ;;  %s140_s30 = int_to_ptr.vmem [resolvable:$true] %s139_s30 }
  0xa6   :  { %s165_s21 = sshll.u32 %s3560_s25, 4  ;;  %s3368_s13 = scalar_lea.vmem %s140_s30, 256  ;;  %s166_s21 = int_to_ptr.vmem [resolvable:$true] %s165_s21 }
  0xa7   :  { %p3369_p9 = scmp.ne.s32.totalorder %s140_s30, %s3368_s13  ;;  %p3373_p10 = scmp.lt.s32.totalorder %s140_s30, %s140_s30 }
  0xa8   :  { %p3374_p11 = scmp.lt.s32.totalorder %s3368_s13, %s3368_s13 }
  0xaa   :  { %123 = dma.hbm_to_vmem [thread:$0]  %s4123_s27, 768, %s118_s9, [#allocation12], %s3547_s5, %s3547_s5, %s3548_s10  }
  0xab   :  { %p3375_p12 = por %p3374_p11, %p3373_p10 }
  0xad   :  { %p3376_p13 = pnand %p3375_p12, %p3369_p9 }
  0xaf   :  { %3379 = shalt.err (!%p3376_p13)
}
  0xb0   :  { %s4124_s8 = sld [smem:[#allocation56_spill]]  ;;  %s3388_s4 = scalar_lea.vmem %s166_s21, 256 }
  0xb1   :  { %p3389_p0 = scmp.ne.s32.totalorder %s166_s21, %s3388_s4  ;;  %p3393_p1 = scmp.lt.s32.totalorder %s166_s21, %s166_s21 }
  0xb2   :  { %p3394_p2 = scmp.lt.s32.totalorder %s3388_s4, %s3388_s4 }
  0xb4   :  { %p3395_p3 = por %p3394_p2, %p3393_p1 }
  0xb6   :  { %145 = dma.hbm_to_vmem [thread:$0]  %s4124_s8, 256, %s140_s30, [#allocation15], %s3547_s5, %s3547_s5, %s3548_s10  }
  0xb7   :  { %p3396_p4 = pnand %p3395_p3, %p3389_p0 }
  0xb9   :  { %3399 = shalt.err (!%p3396_p4)
}
  0xba   :  { %171 = dma.hbm_to_vmem [thread:$0]  %s4087_s12, 256, %s166_s21, [#allocation18], %s3547_s5, %s3547_s5, %s3548_s10  }
  0xbb   :  { %s3561_s29 = smov [#allocation22]   ;;  %s3562_s6 = smov [#allocation25]  }
  0xbc   :  { %s189_s0 = sshll.u32 %s3561_s29, 4  ;;  %s213_s2 = sshll.u32 %s3562_s6, 4  ;;  %s190_s0 = int_to_ptr.vmem [resolvable:$true] %s189_s0  ;;  %s214_s2 = int_to_ptr.vmem [resolvable:$true] %s213_s2 }
  0xbd   :  { %s3408_s17 = scalar_lea.vmem %s190_s0, 256  ;;  %p3413_p6 = scmp.lt.s32.totalorder %s190_s0, %s190_s0 }
  0xbe   :  { %p3409_p5 = scmp.ne.s32.totalorder %s190_s0, %s3408_s17  ;;  %p3414_p7 = scmp.lt.s32.totalorder %s3408_s17, %s3408_s17 }
  0xc0   :  { %p3415_p8 = por %p3414_p7, %p3413_p6 }
  0xc2   :  { %p3416_p9 = pnand %p3415_p8, %p3409_p5 }
  0xc4   :  { %3419 = shalt.err (!%p3416_p9)
}
  0xc5   :  { %195 = dma.hbm_to_vmem [thread:$0]  %s4089_s14, 256, %s190_s0, [#allocation21], %s3547_s5, %s3547_s5, %s3548_s10  }
  0xc6   :  { %s3428_s12 = scalar_lea.vmem %s214_s2, 768  ;;  %p3433_p11 = scmp.lt.s32.totalorder %s214_s2, %s214_s2 }
  0xc7   :  { %p3429_p10 = scmp.ne.s32.totalorder %s214_s2, %s3428_s12  ;;  %p3434_p12 = scmp.lt.s32.totalorder %s3428_s12, %s3428_s12 }
  0xc9   :  { %p3435_p13 = por %p3434_p12, %p3433_p11 }
  0xcb   :  { %p3436_p0 = pnand %p3435_p13, %p3429_p10 }
  0xcd   :  { %3439 = shalt.err (!%p3436_p0)
}
  0xce   :  { %219 = dma.hbm_to_vmem [thread:$0]  %s4091_s16, 768, %s214_s2, [#allocation24], %s3547_s5, %s3547_s5, %s3548_s10  }
  0xcf   :  { %s3563_s25 = smov [#allocation28]   ;;  %s3564_s13 = smov [#allocation31]  }
  0xd0   :  { %s236_s21 = sshll.u32 %s3563_s25, 4  ;;  %s263_s14 = sshll.u32 %s3564_s13, 4  ;;  %s237_s21 = int_to_ptr.vmem [resolvable:$true] %s236_s21  ;;  %s264_s14 = int_to_ptr.vmem [resolvable:$true] %s263_s14 }
  0xd1   :  { %s3448_s7 = scalar_lea.vmem %s237_s21, 16  ;;  %s3452_s28 = scalar_lea.vmem %s237_s21, 32 }
  0xd2   :  { %p3449_p1 = scmp.ne.s32.totalorder %s237_s21, %s3448_s7  ;;  %p3453_p2 = scmp.lt.s32.totalorder %s237_s21, %s237_s21 }
  0xd3   :  { %p3454_p3 = scmp.lt.s32.totalorder %s3452_s28, %s3448_s7 }
  0xd5   :  { %p3455_p4 = por %p3454_p3, %p3453_p2 }
  0xd7   :  { %p3456_p5 = pnand %p3455_p4, %p3449_p1 }
  0xd9   :  { %3459 = shalt.err (!%p3456_p5)
}
  0xda   :  { %239 = dma.hbm_to_vmem [thread:$0]  %s4093_s18, 16, %s237_s21, [#allocation27]  }
  0xdb   :  { %s3468_s9 = scalar_lea.vmem %s264_s14, 256  ;;  %p3473_p7 = scmp.lt.s32.totalorder %s264_s14, %s264_s14 }
  0xdc   :  { %p3469_p6 = scmp.ne.s32.totalorder %s264_s14, %s3468_s9  ;;  %p3474_p8 = scmp.lt.s32.totalorder %s3468_s9, %s3468_s9 }
  0xde   :  { %p3475_p9 = por %p3474_p8, %p3473_p7 }
  0xe0   :  { %p3476_p10 = pnand %p3475_p9, %p3469_p6 }
  0xe2   :  { %3479 = shalt.err (!%p3476_p10)
}
  0xe3   :  { %269 = dma.hbm_to_vmem [thread:$0]  %s4098_s23, 256, %s264_s14, [#allocation30], %s3547_s5, %s3547_s5, %s3548_s10  }
  0xe4   :  { %3520 = dma.done.wait [#allocation3], 32  }
  0xe5   :  { %3521 = vsyncadd [#allocation3], 4294967264 }
  0xe6   :  { %3522 = dma.done.wait [#allocation6], 288  }
  0xe7   :  { %3523 = vsyncadd [#allocation6], 4294967008 }
  0xe8   :  { %3524 = dma.done.wait [#allocation9], 512  }
  0xe9   :  { %3525 = vsyncadd [#allocation9], 4294966784 }
  0xea   :  { %3526 = dma.done.wait [#allocation12], 800  }
  0xeb   :  { %3527 = vsyncadd [#allocation12], 4294966496 }
  0xec   :  { %3528 = dma.done.wait [#allocation15], 272  }
  0xed   :  { %3529 = vsyncadd [#allocation15], 4294967024 }
  0xee   :  { %3530 = dma.done.wait [#allocation18], 512  }
  0xef   :  { %3531 = vsyncadd [#allocation18], 4294966784 }
  0xf0   :  { %3532 = dma.done.wait [#allocation21], 512  }
  0xf1   :  { %3533 = vsyncadd [#allocation21], 4294966784 }
  0xf2   :  { %3534 = dma.done.wait [#allocation24], 1024  }
  0xf3   :  { %3535 = vsyncadd [#allocation24], 4294966272 }
  0xf4   :  { %3536 = dma.done.wait [#allocation27], 32  }
  0xf5   :  { %3537 = vsyncadd [#allocation27], 4294967264 }
  0xf6   :  { %3538 = dma.done.wait [#allocation30], 512  }
  0xf7   :  { %3539 = vsyncadd [#allocation30], 4294966784  ;;  %v383_v0 = vld [vmem:[#allocation13 + $0x8] sm:$0xff]  ;;  %s4125_s5 = sld [smem:[#allocation53_spill]]  ;;  %v382_v2 = vld [vmem:[#allocation13] sm:$0xff]  ;;  %vm340_vm0 = vcmask 1041408  }
  0xf8   :  { %2870 = vmatprep.subr.mxu0 %v383_v0  ;;  %v3811_v4 = vld [vmem:[#allocation10] sm:$0xff]  ;;  %vm384_vm1 = vcmask 130048   ;;  %v3817_v8 = vld [vmem:[#allocation10 + $0x8] sm:$0xff]  ;;  %vm561_vm2 = vcmask 1046528   ;;  %vm746_vm3 = vcmask 1045504   ;;  %v744_v38 = vld [vmem:[#allocation13 + $0x20] sm:$0xff] }
  0xf9   :  { %v3813_v5 = vld [vmem:[#allocation7] sm:$0xff]  ;;  %2871 = vmatpush3.msra.mxu0 %v383_v0  ;;  %v348_v6 = vrot.slane %v3811_v4, 6  ;;  %v3819_v9 = vld [vmem:[#allocation7 + $0x8] sm:$0xff]  ;;  %v349_v10 = vrot.slane %v3817_v8, 6  ;;  %v3565_v44 = vmov 0.0   ;;  %vm3566_vm4 = vmmov 0  }
  0xfa   :  { %v341_v7 = vrot.slane %v3813_v5, 6  ;;  %2872 = vmatprep.subr.mxu0 %v382_v2  ;;  %v342_v11 = vrot.slane %v3819_v9, 6  ;;  %v560_v12 = vld [vmem:[#allocation13 + $0x18] sm:$0xff]  ;;  %v559_v20 = vld [vmem:[#allocation13 + $0x10] sm:$0xff]  ;;  %v745_v34 = vld [vmem:[#allocation13 + $0x28] sm:$0xff]  ;;  %v353_v0 = vlaneseq  ;;  %vm1163_vm9 = vcmask 261120  }
  0xfb   :  { %2873 = vmatpush3.msra.mxu0 %v382_v2  ;;  %v352_v14 = vsel %vm340_vm0, 0.0, %v348_v6  ;;  %v350_v18 = vsel %vm340_vm0, %v348_v6, %v349_v10  ;;  %v565_v22 = vrot.slane %v349_v10, 1  ;;  %v750_v36 = vrot.slane %v349_v10, 2  ;;  %v927_v45 = vld [vmem:[#allocation16 + $0x8] sm:$0xff]  ;;  %v929_v46 = vld [vmem:[#allocation17 + $0x8] sm:$0xff]  ;;  %v926_v47 = vld [vmem:[#allocation16] sm:$0xff] }
  0xfc   :  { %v345_v15 = vsel %vm340_vm0, 0.0, %v341_v7  ;;  %2874 = vmatprep.mubr.msk.f32.mxu0 %vm384_vm1, %v352_v14  ;;  %v562_v16 = vrot.slane %v352_v14, 1  ;;  %v343_v19 = vsel %vm340_vm0, %v341_v7, %v342_v11  ;;  %2884 = vmatprep.subr.mxu0 %v560_v12  ;;  %v649_v23 = vrot.slane %v342_v11, 1  ;;  %v3862_v48 = vld [vmem:[#allocation2] sm:$0x3]  ;;  %v928_v49 = vld [vmem:[#allocation17] sm:$0xff] }
  0xfd   :  { %v381_v1 = vld [vmem:[%s4125_s5 + $0x8] sm:$0xff]  ;;  %v380_v3 = vld [vmem:[%s4125_s5] sm:$0xff]  ;;  %v2735_v13 = vld [vmem:[%s4125_s5 + $0x18] sm:$0xff]  ;;  %2881 = vmatprep.mubr.msk.f32.mxu1 %vm384_vm1, %v345_v15  ;;  %v646_v17 = vrot.slane %v345_v15, 1  ;;  %2875 = vmatmul.mubr.msk.f32.vlgmr.msra.gmra.mxu0 %vm384_vm1, %v350_v18  ;;  %v563_v24 = vrot.slane %v350_v18, 1  ;;  %v647_v25 = vrot.slane %v343_v19, 1 }
  0xfe   :  { %2877 = vmatprep.subr.mxu1 %v381_v1  ;;  %v2734_v21 = vld [vmem:[%s4125_s5 + $0x10] sm:$0xff]  ;;  %v747_v26 = vrot.slane %v352_v14, 2  ;;  %2885 = vmatpush3.msra.mxu0 %v560_v12  ;;  %v748_v27 = vrot.slane %v350_v18, 2  ;;  %v831_v31 = vrot.slane %v345_v15, 2  ;;  %v832_v32 = vrot.slane %v343_v19, 2  ;;  %v2741_v35 = vld [vmem:[%s4125_s5 + $0x28] sm:$0xff] }
  0xff   :  { %2878 = vmatpush3.msra.mxu1 %v381_v1  ;;  %2886 = vmatprep.subr.mxu0 %v559_v20  ;;  %v564_v28 = vsel %vm561_vm2, %v562_v16, %v563_v24  ;;  %v648_v29 = vsel %vm561_vm2, %v646_v17, %v647_v25  ;;  %v566_v30 = vsel %vm561_vm2, %v563_v24, %v565_v22  ;;  %v834_v37 = vrot.slane %v342_v11, 2  ;;  %v2740_v39 = vld [vmem:[%s4125_s5 + $0x20] sm:$0xff]  ;;  %v1079_v50 = vld [vmem:[%s4086_s11 + $0x18] sm:$0xff]  ;;  %v1081_v52 = vld [vmem:[#allocation19 + $0x8] sm:$0xff]  ;;  %s3570_s4 = smov 32  }
 0x100   :  { %2879 = vmatprep.subr.mxu1 %v380_v3  ;;  %2887 = vmatpush3.msra.mxu0 %v559_v20  ;;  %v650_v33 = vsel %vm561_vm2, %v647_v25, %v649_v23  ;;  %v749_v40 = vsel %vm746_vm3, %v747_v26, %v748_v27  ;;  %v833_v41 = vsel %vm746_vm3, %v831_v31, %v832_v32  ;;  %v3872_v51 = vld [vmem:[#allocation5] sm:$0x3]  ;;  %v1078_v53 = vld [vmem:[%s4086_s11 + $0x10] sm:$0xff]  ;;  %v1080_v54 = vld [vmem:[#allocation19] sm:$0xff]  ;;  %v3906_v1 = vshrl.u32 %v353_v0, 7 }
 0x101   :  { %2880 = vmatpush3.msra.mxu1 %v380_v3  ;;  %2888 = vmatprep.mubr.msk.f32.mxu0 %vm384_vm1, %v564_v28  ;;  %v751_v42 = vsel %vm746_vm3, %v748_v27, %v750_v36  ;;  %v835_v43 = vsel %vm746_vm3, %v832_v32, %v834_v37  ;;  %v1077_v55 = vld [vmem:[%s4086_s11 + $0x8] sm:$0xff]  ;;  %v3884_v56 = vld [vmem:[#allocation8] sm:$0xff]  ;;  %v3886_v57 = vld [vmem:[#allocation8 + $0x8] sm:$0xff]  ;;  %vm1535_vm10 = vcmask 195584   ;;  %vm1690_vm13 = vcmask 57344  }
 0x102   :  { %2891 = vmatprep.subr.mxu1 %v2735_v13  ;;  %2882 = vmatmul.mubr.msk.f32.vlgmr.msra.gmra.mxu1 %vm384_vm1, %v343_v19  ;;  %v1076_v58 = vld [vmem:[%s4086_s11] sm:$0xff]  ;;  %v1248_v59 = vld [vmem:[#allocation22 + $0x8] sm:$0xff]  ;;  %v1247_v60 = vld [vmem:[#allocation22] sm:$0xff]  ;;  %v355_v2 = vadd.s32 8, %v3906_v1  ;;  %s3568_s11 = smov 104   ;;  %vm1733_vm15 = vcmask 64512  }
 0x103   :  { %2892 = vmatpush3.msra.mxu1 %v2735_v13  ;;  %2895 = vmatprep.mubr.msk.f32.mxu1 %vm384_vm1, %v648_v29  ;;  %v1246_v61 = vld [vmem:[#allocation20 + $0x8] sm:$0xff]  ;;  %v1245_v63 = vld [vmem:[#allocation20] sm:$0xff]  ;;  %vm1731_vm0 = vcmask 58368   ;;  %vm2250_vm2 = vcmask 1041409   ;;  %vm2414_vm3 = vcmask 386048  }
 0x104   :  { %2893 = vmatprep.subr.mxu1 %v2734_v21  ;;  %2889 = vmatmul.mubr.msk.f32.vlgmr.msra.gmra.mxu0 %vm384_vm1, %v566_v30  ;;  %v1408_v62 = vld [vmem:[#allocation23 + $0x8] sm:$0xff] }
 0x105   :  { %2894 = vmatpush3.msra.mxu1 %v2734_v21  ;;  %2898 = vmatprep.subr.mxu0 %v745_v34  ;;  %v2746_v30 = vld [vmem:[#allocation14] ss:$0 sm:$0xff] }
 0x106   :  { %2896 = vmatmul.mubr.msk.f32.vlgmr.msra.gmra.mxu1 %vm384_vm1, %v650_v33  ;;  %2905 = vmatprep.subr.mxu1 %v2741_v35 }
 0x107   :  { %2899 = vmatpush3.msra.mxu0 %v745_v34  ;;  %2906 = vmatpush3.msra.mxu1 %v2741_v35  ;;  %v1407_v34 = vld [vmem:[#allocation23] sm:$0xff] }
 0x108   :  { %2900 = vmatprep.subr.mxu0 %v744_v38  ;;  %2907 = vmatprep.subr.mxu1 %v2740_v39 }
 0x109   :  { %2901 = vmatpush3.msra.mxu0 %v744_v38  ;;  %2902 = vmatprep.mubr.msk.f32.mxu0 %vm384_vm1, %v749_v40  ;;  %v3567_v40 = vmov 1966171168  }
 0x10a   :  { %2908 = vmatpush3.msra.mxu1 %v2740_v39  ;;  %2909 = vmatprep.mubr.msk.f32.mxu1 %vm384_vm1, %v833_v41  ;;  %v1489_v41 = vunpack.c.l.s4 %v3567_v40 }
 0x10b   :  { %2903 = vmatmul.mubr.msk.f32.vlgmr.msra.gmra.mxu0 %vm384_vm1, %v751_v42  ;;  %2910 = vmatmul.mubr.msk.f32.vlgmr.msra.gmra.mxu1 %vm384_vm1, %v835_v43 }
 0x10c   :  { %2919 = vmatprep.subr.mxu1 %v3565_v44  ;;  %2912 = vmatprep.subr.mxu0 %v3565_v44  ;;  %v1490_v42 = vunpack.c.0.s8 %v1489_v41 }
 0x10d   :  { %2920 = vmatpush3.msra.mxu1 %v927_v45  ;;  %2913 = vmatpush3.msra.mxu0 %v929_v46 }
 0x10e   :  { %2921 = vmatprep.subr.mxu1 %v3565_v44  ;;  %2923 = vmatprep.mubr.msk.f32.mxu1 %vm3566_vm4, %v3565_v44  ;;  %v3920_v45 = vsub.s32 %v1490_v42, %v3906_v1 }
 0x10f   :  { %2922 = vmatpush3.msra.mxu1 %v926_v47  ;;  %2914 = vmatprep.subr.mxu0 %v3565_v44 }
 0x110   :  { %2924 = vmatmul.mubr.msk.f32.vlgmr.msra.gmra.mxu1 %vm384_vm1, %v3862_v48  ;;  %2915 = vmatpush3.msra.mxu0 %v928_v49 }
 0x111   :  { %2916 = vmatprep.mubr.msk.f32.mxu0 %vm3566_vm4, %v3565_v44  ;;  %2933 = vmatprep.subr.mxu1 %v1079_v50 }
 0x112   :  { %2917 = vmatmul.mubr.msk.f32.vlgmr.msra.gmra.mxu0 %vm384_vm1, %v3872_v51  ;;  %2934 = vmatpush3.msra.mxu1 %v1079_v50 }
 0x113   :  { %2926 = vmatprep.subr.mxu0 %v1081_v52  ;;  %2935 = vmatprep.subr.mxu1 %v1078_v53 }
 0x114   :  { %2927 = vmatpush3.msra.mxu0 %v1081_v52  ;;  %2936 = vmatpush3.msra.mxu1 %v1078_v53 }
 0x115   :  { %2928 = vmatprep.subr.mxu0 %v1080_v54  ;;  %2937 = vmatprep.subr.mxu1 %v1077_v55 }
 0x116   :  { %2929 = vmatpush3.msra.mxu0 %v1080_v54  ;;  %2930 = vmatprep.mubr.msk.f32.mxu0 %vm384_vm1, %v3884_v56 }
 0x117   :  { %2938 = vmatpush3.msra.mxu1 %v1077_v55  ;;  %2931 = vmatmul.mubr.msk.f32.vlgmr.msra.gmra.mxu0 %vm384_vm1, %v3886_v57 }
 0x118   :  { %2939 = vmatprep.subr.mxu1 %v1076_v58  ;;  %2948 = vmatprep.mubr.msk.f32.mxu0 %vm384_vm1, %v3811_v4 }
 0x119   :  { %2940 = vmatpush3.msra.mxu1 %v1076_v58  ;;  %2944 = vmatprep.subr.mxu0 %v1248_v59 }
 0x11a   :  { %2945 = vmatpush3.msra.mxu0 %v1248_v59  ;;  %2958 = vmatprep.subr.mxu1 %v1408_v62 }
 0x11b   :  { %2946 = vmatprep.subr.mxu0 %v1247_v60 }
 0x11c   :  { %2947 = vmatpush3.msra.mxu0 %v1247_v60 }
 0x11d   :  { %2949 = vmatmul.mubr.msk.f32.vlgmr.msra.gmra.mxu0 %vm384_vm1, %v3817_v8  ;;  %2951 = vmatprep.subr.mxu0 %v1246_v61  ;;  %v360_v8 = vand.u32 7, %v3906_v1 }
 0x11e   :  { %2952 = vmatpush3.msra.mxu0 %v1246_v61  ;;  %2955 = vmatprep.mubr.msk.f32.mxu0 %vm384_vm1, %v3813_v5  ;;  %v367_v5 = vand.u32 7, %v355_v2 }
 0x11f   :  { %2953 = vmatprep.subr.mxu0 %v1245_v63  ;;  %vm730_vm7 = vcmp.ge.s32.totalorder %v360_v8, 1  ;;  %vm545_vm8 = vcmp.ge.s32.totalorder %v360_v8, 2 }
 0x120   :  { %2954 = vmatpush3.msra.mxu0 %v1245_v63  ;;  %vm731_vm5 = vcmp.ge.s32.totalorder %v367_v5, 1  ;;  %vm546_vm6 = vcmp.ge.s32.totalorder %v367_v5, 2  ;;  %v1883_v63 = vsub.s32 0, %v3906_v1  ;;  %v337_v1 = vld [vmem:[#allocation11] sm:$0x3] }
 0x121   :  { %2956 = vmatmul.mubr.msk.f32.vlgmr.msra.gmra.mxu0 %vm384_vm1, %v3819_v9  ;;  %2965 = vmatprep.subr.mxu0 %v3565_v44  ;;  %vm1486_vm11 = vcmp.gt.f32.partialorder %v337_v1, 0.5 }
 0x122   :  { %2967 = vmatprep.mubr.msk.f32.mxu0 %vm3566_vm4, %v3565_v44 }
 0x1bd   :  { %v2876_v3 = vpop.f32.mrf.mxu0 }
 0x1bf   :  { %v456_v6 = vpop.f32.mrf.mxu0 }
 0x1c2   :  { %v2883_v4 = vpop.f32.mrf.mxu1 }
 0x1c3   :  { %v542_v9 = vadd.f32 %v2883_v4, %v2876_v3 }
 0x1c4   :  { %v536_v7 = vpop.f32.mrf.mxu1  ;;  %v2890_v10 = vpop.f32.mrf.mxu0 }
 0x1c5   :  { %v537_v13 = vadd.f32 %v536_v7, %v456_v6  ;;  %v552_v18 = vsel %vm546_vm6, %v542_v9, 0.0  ;;  %v3569_v7 = vmov 0  }
 0x1c6   :  { %v2897_v11 = vpop.f32.mrf.mxu1  ;;  %v637_v14 = vpop.f32.mrf.mxu0  ;;  %v1487_v5 = vsel %vm1486_vm11, 1, %v3569_v7 }
 0x1c7   :  { %v727_v12 = vadd.f32 %v2897_v11, %v2890_v10  ;;  %v551_v20 = vsel %vm545_vm8, %v537_v13, 0.0  ;;  %v1494_v8 = vrot.slane %v1487_v5, %v3920_v45 }
 0x1c8   :  { %v721_v15 = vpop.f32.mrf.mxu1 }
 0x1c9   :  { %v737_v16 = vsel %vm731_vm5, %v727_v12, 0.0  ;;  %v722_v17 = vadd.f32 %v721_v15, %v637_v14  ;;  %v1495_v10 = vcombine.high %v1494_v8, %v1494_v8  ;;  %v1502_v9 = vrot.slane %v1494_v8, %v3920_v45 }
 0x1ca   :  { %v739_v21 = vadd.f32 %v737_v16, %v552_v18  ;;  %vm2523_vm5 = vcmask 392192  }
 0x1cb   :  { %v736_v19 = vsel %vm730_vm7, %v722_v17, 0.0  ;;  %v2904_v22 = vpop.f32.mrf.mxu0  ;;  %v2911_v23 = vpop.f32.mrf.mxu1  ;;  %v3948_v11 = vrot.slane %v1495_v10, %v3920_v45  ;;  %vm3952_vm14 = vcmp.ne.s32.totalorder %v1502_v9, 0 }
 0x1cc   :  { %v738_v24 = vadd.f32 %v736_v19, %v551_v20  ;;  %v912_v25 = vadd.f32 %v2911_v23, %v2904_v22 }
 0x1cd   :  { %v822_v26 = vpop.f32.mrf.mxu0  ;;  %v906_v27 = vpop.f32.mrf.mxu1  ;;  %vm1511_vm12 = vcmp.ne.s32.totalorder %v3948_v11, 0 }
 0x1ce   :  { %v907_v28 = vadd.f32 %v906_v27, %v822_v26  ;;  %v916_v29 = vadd.f32 %v912_v25, %v739_v21 }
 0x1d0   :  { %v915_v31 = vadd.f32 %v907_v28, %v738_v24  ;;  %v925_v33 = vadd.f32 %v2746_v30, %v916_v29  ;;  %v1072_v35 = vpop.f32.mrf.mxu1 }
 0x1d2   :  { %v924_v32 = vadd.f32 %v2746_v30, %v915_v31  ;;  %v999_v36 = vpop.f32.mrf.mxu0  ;;  %v2925_v37 = vpop.f32.mrf.mxu1 }
 0x1d3   :  { %v1073_v38 = vadd.f32 %v1072_v35, %v999_v36 }
 0x1d4   :  { %2941 = vmatprep.mubr.msk.f32.mxu1 %vm1163_vm9, %v924_v32  ;;  %v2918_v39 = vpop.f32.mrf.mxu0 }
 0x1d5   :  { %2942 = vmatmul.mubr.msk.f32.vlgmr.msra.gmra.mxu1 %vm1163_vm9, %v925_v33  ;;  %v1519_v47 = vrot.slane %v1073_v38, %v3920_v45 }
 0x1d6   :  { %2959 = vmatpush3.msra.mxu1 %v1408_v62  ;;  %2962 = vmatprep.mubr.msk.f32.mxu1 %vm384_vm1, %v3884_v56 }
 0x1d7   :  { %2960 = vmatprep.subr.mxu1 %v1407_v34  ;;  %v2932_v43 = vpop.f32.mrf.mxu0  ;;  %v1520_v52 = vcombine.high %v1519_v47, %v1519_v47  ;;  %v1527_v2 = vrot.slane %v1519_v47, %v3920_v45 }
 0x1d8   :  { %2961 = vmatpush3.msra.mxu1 %v1407_v34 }
 0x1d9   :  { %2963 = vmatmul.mubr.msk.f32.vlgmr.msra.gmra.mxu1 %vm384_vm1, %v3886_v57  ;;  %2970 = vmatprep.subr.mxu1 %v3565_v44  ;;  %v1154_v46 = vpop.f32.mrf.mxu0  ;;  %v1534_v59 = vrot.slane %v1520_v52, %v3920_v45  ;;  %v1884_v33 = vrot.slane %v1527_v2, %v1883_v63 }
 0x1da   :  { %2972 = vmatprep.mubr.msk.f32.mxu1 %vm3566_vm4, %v3565_v44 }
 0x1db   :  { %v1966_v4 = vrot.slane %v1534_v59, %v1883_v63 }
 0x1dd   :  { %v2950_v49 = vpop.f32.mrf.mxu0 }
 0x1df   :  { %v1319_v50 = vpop.f32.mrf.mxu0 }
 0x1e1   :  { %v2957_v53 = vpop.f32.mrf.mxu0 }
 0x1e2   :  { %v1404_v56 = vadd.f32 %v2957_v53, %v2950_v49 }
 0x1e3   :  { %v1398_v57 = vpop.f32.mrf.mxu0 }
 0x1e4   :  { %v1399_v61 = vadd.f32 %v1398_v57, %v1319_v50 }
 0x295   :  { %v2943_v54 = vpop.f32.mrf.mxu1 }
 0x296   :  { %v1242_v55 = vadd.f32 %v2943_v54, %v2932_v43 }
 0x297   :  { %v1236_v58 = vpop.f32.mrf.mxu1 }
 0x298   :  { %v1237_v60 = vadd.f32 %v1236_v58, %v1154_v46  ;;  %2971 = vmatpush3.xpose.msk.msra.mxu1 %vm1535_vm10, %v1242_v55 }
 0x299   :  { %v2964_v62 = vpop.f32.mrf.mxu1  ;;  %2980 = vmatprep.subr.mxu1 %v3565_v44 }
 0x29a   :  { %1887 = vrot.lane.b32.xlu1 %v1237_v60, %s3568_s11  ;;  %2966 = vmatpush3.xpose.msk.msra.mxu0 %vm1535_vm10, %v1237_v60  ;;  %v3929_v0 = vadd.f32 %v2964_v62, %v1404_v56 }
 0x29b   :  { %2973 = vmatmul.mubr.msk.f32.vlgmr.msra.gmra.mxu1 %vm1535_vm10, %v1534_v59  ;;  %v1475_v3 = vpop.f32.mrf.mxu1  ;;  %2975 = vmatprep.subr.mxu0 %v3565_v44 }
 0x29c   :  { %v3934_v6 = vadd.f32 %v1475_v3, %v1399_v61  ;;  %2981 = vmatpush3.msra.mxu1 %v3929_v0  ;;  %2982 = vmatprep.mubr.msk.f32.mxu1 %vm3566_vm4, %v3565_v44 }
 0x29d   :  { %2968 = vmatmul.mubr.msk.f32.vlgmr.msra.gmra.mxu0 %vm1535_vm10, %v1527_v2  ;;  %2990 = vmatprep.subr.mxu1 %v3565_v44 }
 0x29e   :  { %1967 = vrot.lane.b32.xlu1 %v1966_v4, %s3568_s11  ;;  %2976 = vmatpush3.msra.mxu0 %v3934_v6 }
 0x29f   :  { %2977 = vmatprep.mubr.msk.f32.mxu0 %vm3566_vm4, %v3565_v44  ;;  %2985 = vmatprep.subr.mxu0 %v3565_v44 }
 0x30c   :  { %v1888_v34 = vpop.permute.xlu1 %1887 }
 0x310   :  { %v1968_v35 = vpop.permute.xlu1 %1967 }
 0x35b   :  { %v1682_v12 = vpop.f32.mrf.mxu1 }
 0x35c   :  { %v1687_v13 = vmul.f32 0.20412415, %v1682_v12 }
 0x35d   :  { %v1607_v14 = vpop.f32.mrf.mxu0  ;;  %v2974_v15 = vpop.f32.mrf.mxu1 }
 0x35e   :  { %v1686_v17 = vmul.f32 0.20412415, %v1607_v14  ;;  %v1689_v18 = vsel %vm1511_vm12, -1e+10, %v1687_v13 }
 0x35f   :  { %v2969_v19 = vpop.f32.mrf.mxu0  ;;  %v1694_v20 = vsel %vm1690_vm13, %v1689_v18, -inf }
 0x360   :  { %1695 = vmax.xlane.f32.xlu0 %v1694_v20  ;;  %v1688_v21 = vsel %vm3952_vm14, -1e+10, %v1686_v17  ;;  %v1880_v20 = vld [vmem:[#allocation25 + $0x10] sm:$0xff] }
 0x361   :  { %v1691_v22 = vsel %vm1690_vm13, %v1688_v21, -inf }
 0x364   :  { %1692 = vmax.xlane.f32.xlu0 %v1691_v22 }
 0x37a   :  { %1969 = vrot.lane.b32.xlu0 %v1242_v55, %s3568_s11 }
 0x3e9   :  { %v1696_v23 = vpop.xlane.xlu0 %1695 }
 0x3ea   :  { %v1698_v24 = vsub.f32 %v1689_v18, %v1696_v23  ;;  %v1878_v23 = vld [vmem:[#allocation25] sm:$0xff] }
 0x3ec   :  { %v1701_v25 = vmul.f32 1.442695, %v1698_v24 }
 0x3ed   :  { %v1693_v26 = vpop.xlane.xlu0 %1692 }
 0x3ee   :  { %3082 = vpow2.f32 %v1701_v25  ;;  %v1697_v27 = vsub.f32 %v1688_v21, %v1693_v26  ;;  %v1879_v21 = vld [vmem:[#allocation25 + $0x8] sm:$0xff] }
 0x3f0   :  { %v1699_v28 = vmul.f32 1.442695, %v1697_v27  ;;  %v2246_v27 = vld [vmem:[#allocation25 + $0x28] sm:$0xff] }
 0x3f1   :  { %v1970_v40 = vpop.permute.xlu0 %1969 }
 0x3f2   :  { %3084 = vpow2.f32 %v1699_v28  ;;  %v2245_v28 = vld [vmem:[#allocation25 + $0x20] sm:$0xff] }
 0x3fb   :  { %v3083_v29 = vpop.eup %3082 }
 0x3fc   :  { %v1706_v30 = vsel %vm1690_vm13, %v3083_v29, 0.0 }
 0x3fd   :  { %1707 = vadd.xlane.f32.xlu1 %v1706_v30 }
 0x3ff   :  { %v3085_v31 = vpop.eup %3084 }
 0x400   :  { %v1703_v32 = vsel %vm1690_vm13, %v3085_v31, 0.0 }
 0x401   :  { %1704 = vadd.xlane.f32.xlu1 %v1703_v32 }
 0x412   :  { %1885 = vrot.lane.b32.xlu1 %v1884_v33, %s3568_s11 }
 0x486   :  { %v1708_v36 = vpop.xlane.xlu1 %1707 }
 0x487   :  { %3086 = vrcp.f32 %v1708_v36 }
 0x48a   :  { %v1705_v37 = vpop.xlane.xlu1 %1704 }
 0x48b   :  { %3088 = vrcp.f32 %v1705_v37  ;;  %v2411_v37 = vsel %vm384_vm1, %v3862_v48, 0.0 }
 0x48e   :  { %v1886_v47 = vpop.permute.xlu1 %1885 }
 0x494   :  { %v3087_v38 = vpop.eup %3086 }
 0x495   :  { %v1712_v39 = vmul.f32 %v3087_v38, %v3083_v29  ;;  %v2244_v29 = vld [vmem:[#allocation25 + $0x18] sm:$0xff] }
 0x497   :  { %2983 = vmatmul.mubr.msk.f32.vlgmr.msra.gmra.mxu1 %vm1733_vm15, %v1712_v39 }
 0x498   :  { %v3089_v41 = vpop.eup %3088  ;;  %2991 = vmatpush3.xpose.msk.msra.mxu1 %vm1535_vm10, %v1970_v40  ;;  %2992 = vmatprep.mubr.msk.f32.mxu1 %vm3566_vm4, %v3565_v44 }
 0x499   :  { %v1711_v42 = vmul.f32 %v3089_v41, %v3085_v31  ;;  %3000 = vmatprep.subr.mxu1 %v3565_v44 }
 0x49b   :  { %v1715_v43 = vcombine.low %v1711_v42, %v1712_v39  ;;  %2978 = vmatmul.mubr.msk.f32.vlgmr.msra.gmra.mxu0 %vm1733_vm15, %v1711_v42  ;;  %2993 = vmatmul.mubr.msk.f32.vlgmr.msra.gmra.mxu1 %vm1535_vm10, %v1968_v35 }
 0x49c   :  { %2986 = vmatpush3.xpose.msk.msra.mxu0 %vm1535_vm10, %v1888_v34  ;;  %2987 = vmatprep.mubr.msk.f32.mxu0 %vm3566_vm4, %v3565_v44 }
 0x49d   :  { %2995 = vmatprep.subr.mxu0 %v3565_v44  ;;  %3002 = vmatprep.mubr.msk.f32.mxu1 %vm3566_vm4, %v3565_v44  ;;  %v1722_v46 = vrot.slane %v1715_v43, %v3920_v45 }
 0x49f   :  { %2988 = vmatmul.mubr.msk.f32.vlgmr.msra.gmra.mxu0 %vm1535_vm10, %v1886_v47  ;;  %v1729_v49 = vrot.slane %v1722_v46, %v3920_v45 }
 0x4a0   :  { %2997 = vmatprep.mubr.msk.f32.mxu0 %vm3566_vm4, %v3565_v44 }
 0x4a1   :  { %1732 = vst.msk [vmem:[#allocation33] sm:$0x3] %vm1731_vm0, %v1729_v49 }
 0x557   :  { %v1874_v50 = vpop.f32.mrf.mxu1 }
 0x558   :  { %v2326_v53 = vrot.slane %v1874_v50, 7 }
 0x559   :  { %v2984_v52 = vpop.f32.mrf.mxu1 }
 0x55b   :  { %v1802_v54 = vpop.f32.mrf.mxu0  ;;  %v2041_v55 = vpop.f32.mrf.mxu1 }
 0x55c   :  { %v2327_v56 = vsel %vm2250_vm2, %v2326_v53, %v1802_v54  ;;  %v2046_v57 = vmul.f32 0.20412415, %v2041_v55  ;;  %v2450_v55 = vld [vmem:[%s4095_s20 + $0x28] sm:$0xff] }
 0x55d   :  { %v2979_v58 = vpop.f32.mrf.mxu0  ;;  %v2994_v59 = vpop.f32.mrf.mxu1 }
 0x55e   :  { %v2048_v60 = vsel %vm1511_vm12, -1e+10, %v2046_v57  ;;  %v2448_v57 = vld [vmem:[%s4095_s20 + $0x18] sm:$0xff]  ;;  %v2447_v58 = vld [vmem:[%s4095_s20 + $0x10] sm:$0xff]  ;;  %v2452_v59 = vld [vmem:[#allocation29 + $0x8] sm:$0xff] }
 0x55f   :  { %v1959_v61 = vpop.f32.mrf.mxu0  ;;  %v2052_v62 = vsel %vm1690_vm13, %v2048_v60, -inf }
 0x560   :  { %v2045_v63 = vmul.f32 0.20412415, %v1959_v61  ;;  %2053 = vmax.xlane.f32.xlu0 %v2052_v62  ;;  %v2451_v61 = vld [vmem:[#allocation29] sm:$0xff] }
 0x561   :  { %v2989_v2 = vpop.f32.mrf.mxu0  ;;  %v2445_v62 = vld [vmem:[%s4095_s20] sm:$0xff] }
 0x562   :  { %v2047_v3 = vsel %vm3952_vm14, -1e+10, %v2045_v63 }
 0x563   :  { %v2049_v4 = vsel %vm1690_vm13, %v2047_v3, -inf }
 0x564   :  { %2050 = vmax.xlane.f32.xlu1 %v2049_v4 }
 0x575   :  { %2092 = vrot.lane.b32.xlu1 %v3934_v6, %s3568_s11 }
 0x579   :  { %2408 = vrot.lane.b32.xlu1 %v3872_v51, %s3570_s4  ;;  %v2773_v51 = vld [vmem:[#allocation26] ss:$0 sm:$0xff] }
 0x5e9   :  { %v2054_v1 = vpop.xlane.xlu0 %2053 }
 0x5ea   :  { %v2056_v7 = vsub.f32 %v2048_v60, %v2054_v1  ;;  %v2446_v60 = vld [vmem:[%s4095_s20 + $0x8] sm:$0xff]  ;;  %v2774_v1 = vld [vmem:[#allocation28] ss:$0 sm:$0xff] }
 0x5ec   :  { %v2059_v5 = vmul.f32 1.442695, %v2056_v7 }
 0x5ed   :  { %v2051_v8 = vpop.xlane.xlu1 %2050 }
 0x5ee   :  { %3090 = vpow2.f32 %v2059_v5  ;;  %v2055_v10 = vsub.f32 %v2047_v3, %v2051_v8  ;;  %v2775_v5 = vld [vmem:[%s4094_s19] ss:$0 sm:$0xff]  ;;  %s3571_s19 = smov [#allocation33]  }
 0x5ef   :  { %s2705_s3 = sshll.u32 %s3571_s19, 4  ;;  %s2706_s3 = int_to_ptr.vmem [resolvable:$true] %s2705_s3 }
 0x5f0   :  { %v2057_v11 = vmul.f32 1.442695, %v2055_v10  ;;  %s3480_s30 = scalar_lea.vmem %s2706_s3, 64  ;;  %p3485_p12 = scmp.lt.s32.totalorder %s2706_s3, %s2706_s3 }
 0x5f1   :  { %v2093_v9 = vpop.permute.xlu1 %2092  ;;  %p3481_p11 = scmp.ne.s32.totalorder %s2706_s3, %s3480_s30  ;;  %p3486_p13 = scmp.lt.s32.totalorder %s3480_s30, %s3480_s30 }
 0x5f2   :  { %3092 = vpow2.f32 %v2057_v11  ;;  %2996 = vmatpush3.msra.mxu0 %v2093_v9  ;;  %v2607_v9 = vld [vmem:[#allocation31 + $0x8] sm:$0xff] }
 0x5f3   :  { %3005 = vmatprep.subr.mxu0 %v3565_v44  ;;  %p3487_p0 = por %p3486_p13, %p3485_p12 }
 0x5f5   :  { %v2409_v38 = vpop.permute.xlu1 %2408  ;;  %p3488_p1 = pnand %p3487_p0, %p3481_p11 }
 0x5f6   :  { %v2412_v42 = vsel %vm1163_vm9, %v2411_v37, %v2409_v38 }
 0x5fb   :  { %v3091_v12 = vpop.eup %3090 }
 0x5fc   :  { %v2064_v13 = vsel %vm1690_vm13, %v3091_v12, 0.0 }
 0x5fd   :  { %2065 = vadd.xlane.f32.xlu0 %v2064_v13 }
 0x5ff   :  { %v3093_v14 = vpop.eup %3092 }
 0x600   :  { %v2061_v15 = vsel %vm1690_vm13, %v3093_v14, 0.0 }
 0x601   :  { %2062 = vadd.xlane.f32.xlu0 %v2061_v15 }
 0x617   :  { %2168 = vrot.lane.b32.xlu0 %v3929_v0, %s3568_s11 }
 0x686   :  { %v2066_v6 = vpop.xlane.xlu0 %2065 }
 0x687   :  { %3094 = vrcp.f32 %v2066_v6 }
 0x68a   :  { %v2063_v16 = vpop.xlane.xlu0 %2062 }
 0x68b   :  { %3096 = vrcp.f32 %v2063_v16 }
 0x68e   :  { %v2169_v17 = vpop.permute.xlu0 %2168 }
 0x68f   :  { %3001 = vmatpush3.msra.mxu1 %v2169_v17 }
 0x690   :  { %3014 = vmatprep.subr.mxu1 %v3565_v44 }
 0x694   :  { %v3095_v18 = vpop.eup %3094 }
 0x695   :  { %v2070_v19 = vmul.f32 %v3095_v18, %v3091_v12  ;;  %v2606_v12 = vld [vmem:[#allocation31] sm:$0xff] }
 0x697   :  { %3003 = vmatmul.mubr.msk.f32.vlgmr.msra.gmra.mxu1 %vm1733_vm15, %v2070_v19 }
 0x698   :  { %v3097_v22 = vpop.eup %3096  ;;  %3015 = vmatpush3.msra.mxu1 %v1880_v20  ;;  %3020 = vmatprep.mubr.msk.f32.mxu1 %vm3566_vm4, %v3565_v44 }
 0x699   :  { %3016 = vmatprep.subr.mxu1 %v3565_v44  ;;  %v2069_v0 = vmul.f32 %v3097_v22, %v3093_v14  ;;  %v2778_v14 = vld [vmem:[%s4097_s22] ss:$0 sm:$0xff] }
 0x69a   :  { %3017 = vmatpush3.msra.mxu1 %v1879_v21 }
 0x69b   :  { %3018 = vmatprep.subr.mxu1 %v3565_v44  ;;  %v2073_v24 = vcombine.low %v2069_v0, %v2070_v19  ;;  %2998 = vmatmul.mubr.msk.f32.vlgmr.msra.gmra.mxu0 %vm1733_vm15, %v2069_v0 }
 0x69c   :  { %3019 = vmatpush3.msra.mxu1 %v1878_v23  ;;  %3011 = vmatprep.mubr.msk.f32.mxu0 %vm3566_vm4, %v3565_v44 }
 0x69d   :  { %3021 = vmatmul.mubr.msk.f32.vlgmr.msra.gmra.mxu1 %vm1535_vm10, %v2327_v56  ;;  %3030 = vmatprep.subr.mxu1 %v3565_v44  ;;  %v2080_v25 = vrot.slane %v2073_v24, %v3920_v45  ;;  %v2449_v56 = vld [vmem:[%s4095_s20 + $0x20] sm:$0xff] }
 0x69e   :  { %3042 = vmatprep.mubr.msk.f32.mxu1 %vm3566_vm4, %v3565_v44  ;;  %3006 = vmatpush3.msra.mxu0 %v2246_v27 }
 0x69f   :  { %v2087_v26 = vrot.slane %v2080_v25, %v3920_v45  ;;  %3007 = vmatprep.subr.mxu0 %v3565_v44  ;;  %3031 = vmatpush3.msra.mxu1 %v2450_v55 }
 0x6a0   :  { %3008 = vmatpush3.msra.mxu0 %v2245_v28  ;;  %3032 = vmatprep.subr.mxu1 %v3565_v44 }
 0x6a1   :  { %2090 = vst.msk [vmem:[#allocation33 + $0x2] sm:$0x3] %vm1731_vm0, %v2087_v26  ;;  %3009 = vmatprep.subr.mxu0 %v3565_v44  ;;  %3033 = vmatpush3.msra.mxu1 %v2449_v56 }
 0x6a2   :  { %3010 = vmatpush3.msra.mxu0 %v2244_v29  ;;  %3034 = vmatprep.subr.mxu1 %v3565_v44 }
 0x6a3   :  { %3023 = vmatprep.subr.mxu0 %v3565_v44  ;;  %3035 = vmatpush3.msra.mxu1 %v2448_v57 }
 0x6a4   :  { %3036 = vmatprep.subr.mxu1 %v3565_v44 }
 0x6a5   :  { %3037 = vmatpush3.msra.mxu1 %v2447_v58 }
 0x6a6   :  { %3038 = vmatprep.subr.mxu1 %v3565_v44 }
 0x6a7   :  { %3039 = vmatpush3.msra.mxu1 %v2446_v60 }
 0x6a8   :  { %3040 = vmatprep.subr.mxu1 %v3565_v44 }
 0x6a9   :  { %3041 = vmatpush3.msra.mxu1 %v2445_v62 }
 0x757   :  { %v2239_v30 = vpop.f32.mrf.mxu1 }
 0x758   :  { %v2249_v31 = vrot.slane %v2239_v30, 7 }
 0x759   :  { %v3004_v45 = vpop.f32.mrf.mxu1 }
 0x75b   :  { %v2163_v32 = vpop.f32.mrf.mxu0 }
 0x75c   :  { %v2251_v33 = vsel %vm2250_vm2, %v2249_v31, %v2163_v32 }
 0x75d   :  { %v2396_v34 = vpop.f32.mrf.mxu1  ;;  %v2999_v35 = vpop.f32.mrf.mxu0  ;;  %3012 = vmatmul.mubr.msk.f32.vlgmr.msra.gmra.mxu0 %vm1535_vm10, %v2251_v33 }
 0x75e   :  { %3027 = vmatprep.mubr.msk.f32.mxu0 %vm3566_vm4, %v3565_v44  ;;  %3024 = vmatpush3.msra.mxu0 %v2452_v59 }
 0x75f   :  { %v3022_v36 = vpop.f32.mrf.mxu1  ;;  %3025 = vmatprep.subr.mxu0 %v3565_v44 }
 0x760   :  { %3026 = vmatpush3.msra.mxu0 %v2451_v61 }
 0x761   :  { %3028 = vmatmul.mubr.msk.f32.vlgmr.msra.gmra.mxu0 %vm384_vm1, %v3862_v48  ;;  %3045 = vmatprep.subr.mxu0 %v3565_v44 }
 0x762   :  { %3049 = vmatprep.mubr.msk.f32.mxu0 %vm3566_vm4, %v3565_v44  ;;  %3046 = vmatpush3.msra.mxu0 %v2607_v9 }
 0x763   :  { %3047 = vmatprep.subr.mxu0 %v3565_v44 }
 0x764   :  { %3048 = vmatpush3.msra.mxu0 %v2606_v12 }
 0x81d   :  { %v2320_v39 = vpop.f32.mrf.mxu0 }
 0x81e   :  { %v2397_v40 = vadd.f32 %v2396_v34, %v2320_v39 }
 0x81f   :  { %v3013_v41 = vpop.f32.mrf.mxu0 }
 0x820   :  { %v2407_v43 = vadd.f32 %v2773_v51, %v2397_v40 }
 0x821   :  { %v2519_v10 = vpop.f32.mrf.mxu0 }
 0x822   :  { %v2413_v46 = vadd.f32 %v2412_v42, %v2407_v43 }
 0x823   :  { %v3029_v11 = vpop.f32.mrf.mxu0 }
 0x824   :  { %v2415_v47 = vsel %vm2414_vm3, %v2413_v46, 0.0 }
 0x825   :  { %2416 = vadd.xlane.f32.xlu1 %v2415_v47 }
 0x8ae   :  { %v2417_v49 = vpop.xlane.xlu1 %2416 }
 0x8af   :  { %v2419_v50 = vmul.f32 0.020833334, %v2417_v49 }
 0x8b1   :  { %v2420_v52 = vsub.f32 %v2413_v46, %v2419_v50 }
 0x8b3   :  { %v2421_v53 = vmul.f32 %v2420_v52, %v2420_v52 }
 0x8b5   :  { %v2422_v54 = vsel %vm2414_vm3, %v2421_v53, 0.0 }
 0x8b6   :  { %2423 = vadd.xlane.f32.xlu0 %v2422_v54 }
 0x93f   :  { %v2424_v63 = vpop.xlane.xlu0 %2423 }
 0x940   :  { %v2425_v2 = vmul.f32 0.020833334, %v2424_v63 }
 0x942   :  { %v2426_v3 = vadd.f32 1e-05, %v2425_v2 }
 0x944   :  { %3098 = vrsqrt.f32 %v2426_v3 }
 0x951   :  { %v3099_v4 = vpop.eup %3098 }
 0x952   :  { %v2428_v7 = vmul.f32 %v3099_v4, %v2420_v52 }
 0x954   :  { %v2436_v48 = vmul.f32 %v2774_v1, %v2428_v7 }
 0x956   :  { %v2444_v8 = vadd.f32 %v2775_v5, %v2436_v48 }
 0x958   :  { %3043 = vmatmul.mubr.msk.f32.vlgmr.msra.gmra.mxu1 %vm2523_vm5, %v2444_v8 }
 0xa18   :  { %v2593_v13 = vpop.f32.mrf.mxu1 }
 0xa19   :  { %v2594_v15 = vadd.f32 %v2593_v13, %v2519_v10 }
 0xa1a   :  { %v3044_v6 = vpop.f32.mrf.mxu1 }
 0xa1b   :  { %v2604_v16 = vadd.f32 %v2778_v14, %v2594_v15 }
 0xa1d   :  { %v2605_v17 = vmax.f32 %v2604_v16, 0.0 }
 0xa1f   :  { %3050 = vmatmul.mubr.msk.f32.vlgmr.msra.gmra.mxu0 %vm384_vm1, %v2605_v17 }
 0xa20   :  { %3491 = shalt.err (!%p3488_p1)
}
 0xa21   :  { %s3572_s25 = smov 2   ;;  %v2779_v44 = vld [vmem:[%s4099_s24] ss:$0 sm:$0xff]  ;;  %s3573_s7 = smov [#allocation32]   ;;  %vm2688_vm1 = vcmask 123904  }
 0xa22   :  { %2711 = dma.vmem_to_hbm [thread:$0]  %s2706_s3, 64, %s4101_s26, [#allocation34], %s3570_s4, %s3570_s4, %s3572_s25  }
 0xa23   :  { %s2696_s28 = sshll.u32 %s3573_s7, 4  ;;  %s2697_s28 = int_to_ptr.vmem [resolvable:$true] %s2696_s28 }
 0xa24   :  { %s3500_s8 = scalar_lea.vmem %s2697_s28, 32  ;;  %p3505_p3 = scmp.lt.s32.totalorder %s2697_s28, %s2697_s28 }
 0xa25   :  { %p3501_p2 = scmp.ne.s32.totalorder %s2697_s28, %s3500_s8  ;;  %p3506_p4 = scmp.lt.s32.totalorder %s3500_s8, %s3500_s8 }
 0xa27   :  { %p3507_p5 = por %p3506_p4, %p3505_p3 }
 0xa29   :  { %p3508_p6 = pnand %p3507_p5, %p3501_p2 }
 0xadf   :  { %v2684_v18 = vpop.f32.mrf.mxu0 }
 0xae0   :  { %v2685_v19 = vadd.f32 %v2779_v44, %v2684_v18 }
 0xae1   :  { %v3051_v20 = vpop.f32.mrf.mxu0 }
 0xae2   :  { %2689 = vst.msk [vmem:[#allocation32] sm:$0x3] %vm2688_vm1, %v2685_v19 }
 0xae3   :  { %3511 = shalt.err (!%p3508_p6)
}
 0xae4   :  { %s4128_s4 = sld [smem:[#allocation58_spill]] }
 0xaea   :  { %2699 = dma.vmem_to_hbm [thread:$0]  %s2697_s28, 32, %s4128_s4, [#allocation4]  }
 0xaeb   :  { %3540 = dma.done.wait [#allocation4], 32  }
 0xaec   :  { %3541 = vsyncadd [#allocation4], 4294967264 }
 0xaed   :  { %3542 = dma.done.wait [#allocation34], 64  }
 0xaee   :  { %3543 = vsyncadd [#allocation34], 4294967232 }
 0xaef   :  { %2718 = vsyncpa [#allocation3], 1 }
 0xaf0   :  { %2719 = vsyncpa [#allocation6], 1 }
 0xaf1   :  { %2720 = vsyncpa [#allocation9], 1 }
 0xaf2   :  { %2721 = vsyncpa [#allocation12], 1 }
 0xaf3   :  { %2722 = vsyncpa [#allocation15], 1 }
 0xaf4   :  { %2723 = vsyncpa [#allocation18], 1 }
 0xaf5   :  { %2724 = vsyncpa [#allocation21], 1 }
 0xaf6   :  { %2725 = vsyncpa [#allocation24], 1 }
 0xaf7   :  { %2726 = vsyncpa [#allocation27], 1 }
 0xaf8   :  { %2727 = vsyncpa [#allocation30], 1 }
 0xaf9   :  { %2728 = vsyncpa [#allocation4], 1 }
 0xafa   :  { %2729 = vsyncpa [#allocation34], 1 }

</bundles_post_ra>
